<compile_context>
chip_gen: v7x
topology: tpu7x:2x2x1
jax: 0.10.0
libtpu: 0.0.40
codegen_flags: <defaults>
</compile_context>

<pallas_src>
import functools

import jax
import jax.numpy as jnp
from jax.experimental import pallas as pl
from jax.experimental.pallas import tpu as pltpu

_BN_EPS = 1e-5


def _build_im2col(x_ref, xcol_ref, *, wp, lc, c_in, b_blk):
    """In-kernel im2col: 9 lane-shifted copies per image into one (9*c_in, b_blk*lc) slab."""
    for i in range(b_blk):
        for t in range(9):
            off = (t // 3) * wp + (t % 3)          # flat shift of tap (ky, kx); static int
            xcol_ref[t * c_in:(t + 1) * c_in, i * lc:(i + 1) * lc] = \
                x_ref[i, :, off:off + lc]


def _stats_kernel(x_ref, w_ref, m_ref, ps_ref, xcol_ref, *, wp, lc, c_in, b_blk):
    """Per-block partial BN sums / sums of squares (batch-parallel, no cross-step state).

    x_ref  : (b_blk, C_in, L)   bf16  padded, 2x-upsampled images, spatial flattened
    w_ref  : (2*C_out, 9*C_in)  bf16  conv weight, tap-major K (both GLU halves fused)
    m_ref  : (1, b_blk*lc)      f32   validity mask (0 on pad / wrap garbage columns)
    ps_ref : (1, 2, 2*C_out, 1) f32   [sum, sumsq] per channel for this block
    """
    _build_im2col(x_ref, xcol_ref, wp=wp, lc=lc, c_in=c_in, b_blk=b_blk)
    acc = jnp.dot(w_ref[...], xcol_ref[...], preferred_element_type=jnp.float32)
    am = acc * m_ref[...]
    ps_ref[0, 0] = jnp.sum(am, axis=1, keepdims=True)
    ps_ref[0, 1] = jnp.sum(am * acc, axis=1, keepdims=True)


def _apply_kernel(x_ref, w_ref, ss_ref, out_ref, xcol_ref, *, wp, lc, c_in, c_out, b_blk):
    """Conv (recomputed; cheap at small K) + folded BN scale/shift + GLU, batch-parallel.

    ss_ref  : (2, 2*C_out, 1) f32  [scale, shift] folded from the batch statistics
    out_ref : (b_blk, C_out, lc) f32 GLU output in flat padded-row coordinates
    """
    _build_im2col(x_ref, xcol_ref, wp=wp, lc=lc, c_in=c_in, b_blk=b_blk)
    acc = jnp.dot(w_ref[...], xcol_ref[...], preferred_element_type=jnp.float32)
    y = acc * ss_ref[0] + ss_ref[1]                      # (2*C_out, b_blk*lc)
    a = y[:c_out]
    g = y[c_out:]
    glu = a * (0.5 + 0.5 * jnp.tanh(0.5 * g))            # sigmoid via EUP tanh
    for i in range(b_blk):
        out_ref[i] = glu[:, i * lc:(i + 1) * lc].astype(out_ref.dtype)


def upsample_block(x, conv_w, bn_gamma, bn_beta):
    """x: (N, C_in, H, W) f32; conv_w: (2*C_out, C_in, 3, 3); bn_*: (2*C_out,).
    Returns (N, C_out, 2H, 2W) f32 (training-mode BatchNorm batch statistics)."""
    n, c_in, h, w = x.shape
    c2 = conv_w.shape[0]
    c_out = c2 // 2
    h2, w2 = 2 * h, 2 * w

    # Padded width chosen so the flat per-image lane extent lc = 2H*wp is 128-aligned.
    wp = w2 + 2
    while (h2 * wp) % 128:
        wp += 1
    hp = h2 + 3                 # 1 top + 2 bottom pad rows (extra row keeps flat shifts in-bounds)
    flat_len = hp * wp
    lc = h2 * wp

    # Batch blocking: as many images per grid step as comfortably fit VMEM (unroll cap 8).
    per_img = 4 * c_in * flat_len + 18 * c_in * lc + 20 * c_out * lc   # rough bytes incl. buffers
    cap = max(1, min(8, (8 << 20) // max(per_img, 1)))
    b_blk = 1
    for d in range(1, n + 1):
        if n % d == 0 and d <= cap:
            b_blk = d
    nb = n // b_blk
    lcb = b_blk * lc

    # --- XLA-side glue: nearest 2x upsample + zero pad + flatten spatial into bf16 slab ---
    # TODO(synk): fold the 2x nearest upsample into the kernel via the 2x2 sub-pixel (phase)
    # decomposition (four 2x2 convs on the original-resolution image) to avoid materializing
    # and re-reading the 4x-larger slab and to cut MACs from 9 to 4 per output pixel.
    xu = jnp.repeat(jnp.repeat(x, 2, axis=2), 2, axis=3)             # (N, C_in, 2H, 2W)
    xp = jnp.pad(xu, ((0, 0), (0, 0), (1, 2), (1, wp - w2 - 1)))     # (N, C_in, Hp, Wp)
    xf = xp.reshape(n, c_in, flat_len).astype(jnp.bfloat16)          # (N, C_in, L)

    # Conv weight OIHW -> one MXU operand (2*C_out, 9*C_in), tap-major K to match im2col.
    w2d = jnp.transpose(conv_w, (0, 2, 3, 1)).reshape(c2, 9 * c_in).astype(jnp.bfloat16)

    # Per-column validity mask for the BN statistics (excludes pad / wrap garbage columns).
    col = jnp.arange(lc, dtype=jnp.int32) % wp
    mask = jnp.tile((col < w2).astype(jnp.float32), b_blk).reshape(1, lcb)

    cparams = pltpu.CompilerParams(
        dimension_semantics=("parallel",),          # batch-block axis -> megacore on v7x
        vmem_limit_bytes=32 * 1024 * 1024)

    # ---- pass A: per-block partial BN sums / sums-of-squares ----
    stats = pl.pallas_call(
        functools.partial(_stats_kernel, wp=wp, lc=lc, c_in=c_in, b_blk=b_blk),
        out_shape=jax.ShapeDtypeStruct((nb, 2, c2, 1), jnp.float32),
        grid_spec=pltpu.PrefetchScalarGridSpec(
            num_scalar_prefetch=0,
            grid=(nb,),
            in_specs=[
                pl.BlockSpec((b_blk, c_in, flat_len), lambda b: (b, 0, 0)),
                pl.BlockSpec((c2, 9 * c_in), lambda b: (0, 0)),
                pl.BlockSpec((1, lcb), lambda b: (0, 0)),
            ],
            out_specs=pl.BlockSpec((1, 2, c2, 1), lambda b: (b, 0, 0, 0)),
            scratch_shapes=[pltpu.VMEM((9 * c_in, lcb), jnp.bfloat16)]),
        compiler_params=cparams,
    )(xf, w2d, mask)

    # ---- tiny XLA fold: batch statistics -> per-channel BN scale / shift ----
    # NOTE: single-pass E[x^2]-E[x]^2 variance in f32; fine at these magnitudes
    # (switch to shifted sums / Welford if production activations have large means).
    tot = jnp.sum(stats, axis=0)[:, :, 0]            # (2, c2)
    inv_cnt = 1.0 / float(n * h2 * w2)
    mean = tot[0] * inv_cnt
    var = tot[1] * inv_cnt - mean * mean             # biased (training-mode) variance
    scale = bn_gamma * jax.lax.rsqrt(var + _BN_EPS)
    shift = bn_beta - mean * scale
    ss = jnp.stack([scale, shift]).reshape(2, c2, 1).astype(jnp.float32)

    # ---- pass B: conv + folded BN + GLU ----
    out_flat = pl.pallas_call(
        functools.partial(_apply_kernel, wp=wp, lc=lc, c_in=c_in, c_out=c_out, b_blk=b_blk),
        out_shape=jax.ShapeDtypeStruct((n, c_out, lc), jnp.float32),
        grid_spec=pltpu.PrefetchScalarGridSpec(
            num_scalar_prefetch=0,
            grid=(nb,),
            in_specs=[
                pl.BlockSpec((b_blk, c_in, flat_len), lambda b: (b, 0, 0)),
                pl.BlockSpec((c2, 9 * c_in), lambda b: (0, 0)),
                pl.BlockSpec((2, c2, 1), lambda b: (0, 0, 0)),
            ],
            out_specs=pl.BlockSpec((b_blk, c_out, lc), lambda b: (b, 0, 0)),
            scratch_shapes=[pltpu.VMEM((9 * c_in, lcb), jnp.bfloat16)]),
        compiler_params=cparams,
    )(xf, w2d, ss)

    # Drop the pad / wrap garbage columns; layout is already channel-major (NCHW).
    return out_flat.reshape(n, c_out, h2, wp)[:, :, :, :w2]


def _reference(x, conv_w, bn_gamma, bn_beta):
    """Pure-JAX reference matching the PyTorch module (training-mode BN)."""
    xu = jnp.repeat(jnp.repeat(x, 2, axis=2), 2, axis=3)
    y = jax.lax.conv_general_dilated(
        xu, conv_w, window_strides=(1, 1), padding=((1, 1), (1, 1)),
        dimension_numbers=("NCHW", "OIHW", "NCHW"),
        precision=jax.lax.Precision.HIGHEST)
    mean = y.mean(axis=(0, 2, 3), keepdims=True)
    var = ((y - mean) ** 2).mean(axis=(0, 2, 3), keepdims=True)
    yn = (y - mean) / jnp.sqrt(var + _BN_EPS) * bn_gamma.reshape(1, -1, 1, 1) \
         + bn_beta.reshape(1, -1, 1, 1)
    a, b = jnp.split(yn, 2, axis=1)
    return a * jax.nn.sigmoid(b)


if __name__ == "__main__":
    key = jax.random.PRNGKey(0)
    k_x, k_w = jax.random.split(key)

    N, C_IN, C_OUT, H, W = 2, 4, 8, 16, 16
    x = jax.random.normal(k_x, (N, C_IN, H, W), dtype=jnp.float32)
    conv_w = 0.1 * jax.random.normal(k_w, (2 * C_OUT, C_IN, 3, 3), dtype=jnp.float32)
    bn_gamma = jnp.ones((2 * C_OUT,), dtype=jnp.float32)    # PyTorch BatchNorm defaults
    bn_beta = jnp.zeros((2 * C_OUT,), dtype=jnp.float32)

    out = jax.block_until_ready(upsample_block(x, conv_w, bn_gamma, bn_beta))
    assert out.shape == (N, C_OUT, 2 * H, 2 * W), out.shape

    # Check 1: reference with conv inputs rounded to bf16 like the kernel (isolates the
    # kernel structure from the intentional bf16 MXU quantization) -> tight tolerance.
    ref_b = jax.block_until_ready(_reference(
        x.astype(jnp.bfloat16).astype(jnp.float32),
        conv_w.astype(jnp.bfloat16).astype(jnp.float32), bn_gamma, bn_beta))
    if not jnp.allclose(out, ref_b, atol=2e-3, rtol=2e-3):
        raise AssertionError(
            f"bf16-matched reference mismatch, max abs err {jnp.max(jnp.abs(out - ref_b))}")

    # Check 2: full-f32 reference (loose: bf16 MXU inputs are an intentional approximation).
    ref = jax.block_until_ready(_reference(x, conv_w, bn_gamma, bn_beta))
    if not jnp.allclose(out, ref, atol=5e-2, rtol=5e-2):
        raise AssertionError(
            f"f32 reference mismatch, max abs err {jnp.max(jnp.abs(out - ref))}")

    print("KERNEL_OK")
</pallas_src>

<mosaic_0001>
module attributes {stable_mosaic.version = 11 : i64} {
  func.func @_stats_kernel(%arg0: i32, %arg1: memref<2x4x1260xbf16, #tpu.memory_space<vmem>>, %arg2: memref<16x36xbf16, #tpu.memory_space<vmem>>, %arg3: memref<1x2304xf32, #tpu.memory_space<vmem>>, %arg4: memref<1x2x16x1xf32, #tpu.memory_space<vmem>>, %arg5: memref<36x2304xbf16, #tpu.memory_space<vmem>>) attributes {dimension_semantics = [#tpu.dimension_semantics<parallel>], iteration_bounds = array<i64: 1>, scalar_prefetch = 0 : i64, scratch_operands = 1 : i64, tpu.core_type = #tpu.core_type<tc>, window_params = [{transform_indices = @transform_0, window_bounds = array<i64: 2, 4, 1260>}, {pipeline_mode = #tpu.pipeline_mode<synchronous>, transform_indices = @transform_1, window_bounds = array<i64: 16, 36>}, {pipeline_mode = #tpu.pipeline_mode<synchronous>, transform_indices = @transform_2, window_bounds = array<i64: 1, 2304>}, {transform_indices = @transform_3, window_bounds = array<i64: 1, 2, 16, 1>}]} {
    %c0 = arith.constant 0 : index
    %c0_0 = arith.constant 0 : index
    %c0_1 = arith.constant 0 : index
    %0 = vector.load %arg1[%c0, %c0_0, %c0_1] : memref<2x4x1260xbf16, #tpu.memory_space<vmem>>, vector<1x4x1152xbf16>
    %1 = vector.shape_cast %0 : vector<1x4x1152xbf16> to vector<4x1152xbf16>
    %c0_2 = arith.constant 0 : index
    %c0_3 = arith.constant 0 : index
    %2 = vector.load %arg5[%c0_2, %c0_3] : memref<36x2304xbf16, #tpu.memory_space<vmem>>, vector<4x1152xbf16>
    tpu.vector_store %arg5[%c0_2, %c0_3], %1 {strides = array<i32>} : memref<36x2304xbf16, #tpu.memory_space<vmem>>, vector<4x1152xbf16>,
    %c0_4 = arith.constant 0 : index
    %c0_5 = arith.constant 0 : index
    %c1 = arith.constant 1 : index
    %3 = vector.load %arg1[%c0_4, %c0_5, %c1] : memref<2x4x1260xbf16, #tpu.memory_space<vmem>>, vector<1x4x1152xbf16>
    %4 = vector.shape_cast %3 : vector<1x4x1152xbf16> to vector<4x1152xbf16>
    %c4 = arith.constant 4 : index
    %c0_6 = arith.constant 0 : index
    %5 = vector.load %arg5[%c4, %c0_6] : memref<36x2304xbf16, #tpu.memory_space<vmem>>, vector<4x1152xbf16>
    tpu.vector_store %arg5[%c4, %c0_6], %4 {strides = array<i32>} : memref<36x2304xbf16, #tpu.memory_space<vmem>>, vector<4x1152xbf16>,
    %c0_7 = arith.constant 0 : index
    %c0_8 = arith.constant 0 : index
    %c2 = arith.constant 2 : index
    %6 = vector.load %arg1[%c0_7, %c0_8, %c2] : memref<2x4x1260xbf16, #tpu.memory_space<vmem>>, vector<1x4x1152xbf16>
    %7 = vector.shape_cast %6 : vector<1x4x1152xbf16> to vector<4x1152xbf16>
    %c8 = arith.constant 8 : index
    %c0_9 = arith.constant 0 : index
    %8 = vector.load %arg5[%c8, %c0_9] : memref<36x2304xbf16, #tpu.memory_space<vmem>>, vector<4x1152xbf16>
    tpu.vector_store %arg5[%c8, %c0_9], %7 {strides = array<i32>} : memref<36x2304xbf16, #tpu.memory_space<vmem>>, vector<4x1152xbf16>,
    %c0_10 = arith.constant 0 : index
    %c0_11 = arith.constant 0 : index
    %c36 = arith.constant 36 : index
    %9 = vector.load %arg1[%c0_10, %c0_11, %c36] : memref<2x4x1260xbf16, #tpu.memory_space<vmem>>, vector<1x4x1152xbf16>
    %10 = vector.shape_cast %9 : vector<1x4x1152xbf16> to vector<4x1152xbf16>
    %c12 = arith.constant 12 : index
    %c0_12 = arith.constant 0 : index
    %11 = vector.load %arg5[%c12, %c0_12] : memref<36x2304xbf16, #tpu.memory_space<vmem>>, vector<4x1152xbf16>
    tpu.vector_store %arg5[%c12, %c0_12], %10 {strides = array<i32>} : memref<36x2304xbf16, #tpu.memory_space<vmem>>, vector<4x1152xbf16>,
    %c0_13 = arith.constant 0 : index
    %c0_14 = arith.constant 0 : index
    %c37 = arith.constant 37 : index
    %12 = vector.load %arg1[%c0_13, %c0_14, %c37] : memref<2x4x1260xbf16, #tpu.memory_space<vmem>>, vector<1x4x1152xbf16>
    %13 = vector.shape_cast %12 : vector<1x4x1152xbf16> to vector<4x1152xbf16>
    %c16 = arith.constant 16 : index
    %c0_15 = arith.constant 0 : index
    %14 = vector.load %arg5[%c16, %c0_15] : memref<36x2304xbf16, #tpu.memory_space<vmem>>, vector<4x1152xbf16>
    tpu.vector_store %arg5[%c16, %c0_15], %13 {strides = array<i32>} : memref<36x2304xbf16, #tpu.memory_space<vmem>>, vector<4x1152xbf16>,
    %c0_16 = arith.constant 0 : index
    %c0_17 = arith.constant 0 : index
    %c38 = arith.constant 38 : index
    %15 = vector.load %arg1[%c0_16, %c0_17, %c38] : memref<2x4x1260xbf16, #tpu.memory_space<vmem>>, vector<1x4x1152xbf16>
    %16 = vector.shape_cast %15 : vector<1x4x1152xbf16> to vector<4x1152xbf16>
    %c20 = arith.constant 20 : index
    %c0_18 = arith.constant 0 : index
    %17 = vector.load %arg5[%c20, %c0_18] : memref<36x2304xbf16, #tpu.memory_space<vmem>>, vector<4x1152xbf16>
    tpu.vector_store %arg5[%c20, %c0_18], %16 {strides = array<i32>} : memref<36x2304xbf16, #tpu.memory_space<vmem>>, vector<4x1152xbf16>,
    %c0_19 = arith.constant 0 : index
    %c0_20 = arith.constant 0 : index
    %c72 = arith.constant 72 : index
    %18 = vector.load %arg1[%c0_19, %c0_20, %c72] : memref<2x4x1260xbf16, #tpu.memory_space<vmem>>, vector<1x4x1152xbf16>
    %19 = vector.shape_cast %18 : vector<1x4x1152xbf16> to vector<4x1152xbf16>
    %c24 = arith.constant 24 : index
    %c0_21 = arith.constant 0 : index
    %20 = vector.load %arg5[%c24, %c0_21] : memref<36x2304xbf16, #tpu.memory_space<vmem>>, vector<4x1152xbf16>
    tpu.vector_store %arg5[%c24, %c0_21], %19 {strides = array<i32>} : memref<36x2304xbf16, #tpu.memory_space<vmem>>, vector<4x1152xbf16>,
    %c0_22 = arith.constant 0 : index
    %c0_23 = arith.constant 0 : index
    %c73 = arith.constant 73 : index
    %21 = vector.load %arg1[%c0_22, %c0_23, %c73] : memref<2x4x1260xbf16, #tpu.memory_space<vmem>>, vector<1x4x1152xbf16>
    %22 = vector.shape_cast %21 : vector<1x4x1152xbf16> to vector<4x1152xbf16>
    %c28 = arith.constant 28 : index
    %c0_24 = arith.constant 0 : index
    %23 = vector.load %arg5[%c28, %c0_24] : memref<36x2304xbf16, #tpu.memory_space<vmem>>, vector<4x1152xbf16>
    tpu.vector_store %arg5[%c28, %c0_24], %22 {strides = array<i32>} : memref<36x2304xbf16, #tpu.memory_space<vmem>>, vector<4x1152xbf16>,
    %c0_25 = arith.constant 0 : index
    %c0_26 = arith.constant 0 : index
    %c74 = arith.constant 74 : index
    %24 = vector.load %arg1[%c0_25, %c0_26, %c74] : memref<2x4x1260xbf16, #tpu.memory_space<vmem>>, vector<1x4x1152xbf16>
    %25 = vector.shape_cast %24 : vector<1x4x1152xbf16> to vector<4x1152xbf16>
    %c32 = arith.constant 32 : index
    %c0_27 = arith.constant 0 : index
    %26 = vector.load %arg5[%c32, %c0_27] : memref<36x2304xbf16, #tpu.memory_space<vmem>>, vector<4x1152xbf16>
    tpu.vector_store %arg5[%c32, %c0_27], %25 {strides = array<i32>} : memref<36x2304xbf16, #tpu.memory_space<vmem>>, vector<4x1152xbf16>,
    %c1_28 = arith.constant 1 : index
    %c0_29 = arith.constant 0 : index
    %c0_30 = arith.constant 0 : index
    %27 = vector.load %arg1[%c1_28, %c0_29, %c0_30] : memref<2x4x1260xbf16, #tpu.memory_space<vmem>>, vector<1x4x1152xbf16>
    %28 = vector.shape_cast %27 : vector<1x4x1152xbf16> to vector<4x1152xbf16>
    %c0_31 = arith.constant 0 : index
    %c1152 = arith.constant 1152 : index
    %29 = vector.load %arg5[%c0_31, %c1152] : memref<36x2304xbf16, #tpu.memory_space<vmem>>, vector<4x1152xbf16>
    tpu.vector_store %arg5[%c0_31, %c1152], %28 {strides = array<i32>} : memref<36x2304xbf16, #tpu.memory_space<vmem>>, vector<4x1152xbf16>,
    %c1_32 = arith.constant 1 : index
    %c0_33 = arith.constant 0 : index
    %c1_34 = arith.constant 1 : index
    %30 = vector.load %arg1[%c1_32, %c0_33, %c1_34] : memref<2x4x1260xbf16, #tpu.memory_space<vmem>>, vector<1x4x1152xbf16>
    %31 = vector.shape_cast %30 : vector<1x4x1152xbf16> to vector<4x1152xbf16>
    %c4_35 = arith.constant 4 : index
    %c1152_36 = arith.constant 1152 : index
    %32 = vector.load %arg5[%c4_35, %c1152_36] : memref<36x2304xbf16, #tpu.memory_space<vmem>>, vector<4x1152xbf16>
    tpu.vector_store %arg5[%c4_35, %c1152_36], %31 {strides = array<i32>} : memref<36x2304xbf16, #tpu.memory_space<vmem>>, vector<4x1152xbf16>,
    %c1_37 = arith.constant 1 : index
    %c0_38 = arith.constant 0 : index
    %c2_39 = arith.constant 2 : index
    %33 = vector.load %arg1[%c1_37, %c0_38, %c2_39] : memref<2x4x1260xbf16, #tpu.memory_space<vmem>>, vector<1x4x1152xbf16>
    %34 = vector.shape_cast %33 : vector<1x4x1152xbf16> to vector<4x1152xbf16>
    %c8_40 = arith.constant 8 : index
    %c1152_41 = arith.constant 1152 : index
    %35 = vector.load %arg5[%c8_40, %c1152_41] : memref<36x2304xbf16, #tpu.memory_space<vmem>>, vector<4x1152xbf16>
    tpu.vector_store %arg5[%c8_40, %c1152_41], %34 {strides = array<i32>} : memref<36x2304xbf16, #tpu.memory_space<vmem>>, vector<4x1152xbf16>,
    %c1_42 = arith.constant 1 : index
    %c0_43 = arith.constant 0 : index
    %c36_44 = arith.constant 36 : index
    %36 = vector.load %arg1[%c1_42, %c0_43, %c36_44] : memref<2x4x1260xbf16, #tpu.memory_space<vmem>>, vector<1x4x1152xbf16>
    %37 = vector.shape_cast %36 : vector<1x4x1152xbf16> to vector<4x1152xbf16>
    %c12_45 = arith.constant 12 : index
    %c1152_46 = arith.constant 1152 : index
    %38 = vector.load %arg5[%c12_45, %c1152_46] : memref<36x2304xbf16, #tpu.memory_space<vmem>>, vector<4x1152xbf16>
    tpu.vector_store %arg5[%c12_45, %c1152_46], %37 {strides = array<i32>} : memref<36x2304xbf16, #tpu.memory_space<vmem>>, vector<4x1152xbf16>,
    %c1_47 = arith.constant 1 : index
    %c0_48 = arith.constant 0 : index
    %c37_49 = arith.constant 37 : index
    %39 = vector.load %arg1[%c1_47, %c0_48, %c37_49] : memref<2x4x1260xbf16, #tpu.memory_space<vmem>>, vector<1x4x1152xbf16>
    %40 = vector.shape_cast %39 : vector<1x4x1152xbf16> to vector<4x1152xbf16>
    %c16_50 = arith.constant 16 : index
    %c1152_51 = arith.constant 1152 : index
    %41 = vector.load %arg5[%c16_50, %c1152_51] : memref<36x2304xbf16, #tpu.memory_space<vmem>>, vector<4x1152xbf16>
    tpu.vector_store %arg5[%c16_50, %c1152_51], %40 {strides = array<i32>} : memref<36x2304xbf16, #tpu.memory_space<vmem>>, vector<4x1152xbf16>,
    %c1_52 = arith.constant 1 : index
    %c0_53 = arith.constant 0 : index
    %c38_54 = arith.constant 38 : index
    %42 = vector.load %arg1[%c1_52, %c0_53, %c38_54] : memref<2x4x1260xbf16, #tpu.memory_space<vmem>>, vector<1x4x1152xbf16>
    %43 = vector.shape_cast %42 : vector<1x4x1152xbf16> to vector<4x1152xbf16>
    %c20_55 = arith.constant 20 : index
    %c1152_56 = arith.constant 1152 : index
    %44 = vector.load %arg5[%c20_55, %c1152_56] : memref<36x2304xbf16, #tpu.memory_space<vmem>>, vector<4x1152xbf16>
    tpu.vector_store %arg5[%c20_55, %c1152_56], %43 {strides = array<i32>} : memref<36x2304xbf16, #tpu.memory_space<vmem>>, vector<4x1152xbf16>,
    %c1_57 = arith.constant 1 : index
    %c0_58 = arith.constant 0 : index
    %c72_59 = arith.constant 72 : index
    %45 = vector.load %arg1[%c1_57, %c0_58, %c72_59] : memref<2x4x1260xbf16, #tpu.memory_space<vmem>>, vector<1x4x1152xbf16>
    %46 = vector.shape_cast %45 : vector<1x4x1152xbf16> to vector<4x1152xbf16>
    %c24_60 = arith.constant 24 : index
    %c1152_61 = arith.constant 1152 : index
    %47 = vector.load %arg5[%c24_60, %c1152_61] : memref<36x2304xbf16, #tpu.memory_space<vmem>>, vector<4x1152xbf16>
    tpu.vector_store %arg5[%c24_60, %c1152_61], %46 {strides = array<i32>} : memref<36x2304xbf16, #tpu.memory_space<vmem>>, vector<4x1152xbf16>,
    %c1_62 = arith.constant 1 : index
    %c0_63 = arith.constant 0 : index
    %c73_64 = arith.constant 73 : index
    %48 = vector.load %arg1[%c1_62, %c0_63, %c73_64] : memref<2x4x1260xbf16, #tpu.memory_space<vmem>>, vector<1x4x1152xbf16>
    %49 = vector.shape_cast %48 : vector<1x4x1152xbf16> to vector<4x1152xbf16>
    %c28_65 = arith.constant 28 : index
    %c1152_66 = arith.constant 1152 : index
    %50 = vector.load %arg5[%c28_65, %c1152_66] : memref<36x2304xbf16, #tpu.memory_space<vmem>>, vector<4x1152xbf16>
    tpu.vector_store %arg5[%c28_65, %c1152_66], %49 {strides = array<i32>} : memref<36x2304xbf16, #tpu.memory_space<vmem>>, vector<4x1152xbf16>,
    %c1_67 = arith.constant 1 : index
    %c0_68 = arith.constant 0 : index
    %c74_69 = arith.constant 74 : index
    %51 = vector.load %arg1[%c1_67, %c0_68, %c74_69] : memref<2x4x1260xbf16, #tpu.memory_space<vmem>>, vector<1x4x1152xbf16>
    %52 = vector.shape_cast %51 : vector<1x4x1152xbf16> to vector<4x1152xbf16>
    %c32_70 = arith.constant 32 : index
    %c1152_71 = arith.constant 1152 : index
    %53 = vector.load %arg5[%c32_70, %c1152_71] : memref<36x2304xbf16, #tpu.memory_space<vmem>>, vector<4x1152xbf16>
    tpu.vector_store %arg5[%c32_70, %c1152_71], %52 {strides = array<i32>} : memref<36x2304xbf16, #tpu.memory_space<vmem>>, vector<4x1152xbf16>,
    %c0_72 = arith.constant 0 : index
    %c0_73 = arith.constant 0 : index
    %54 = vector.load %arg2[%c0_72, %c0_73] : memref<16x36xbf16, #tpu.memory_space<vmem>>, vector<16x36xbf16>
    %c0_74 = arith.constant 0 : index
    %c0_75 = arith.constant 0 : index
    %55 = vector.load %arg5[%c0_74, %c0_75] : memref<36x2304xbf16, #tpu.memory_space<vmem>>, vector<36x2304xbf16>
    %cst = arith.constant dense<0.000000e+00> : vector<16x2304xf32>
    %56 = tpu.matmul %54, %55, %cst {dimension_numbers = #tpu.dot_dimension_numbers<[1], [0], [0], [1], [0, 0, 1, 1], [], []>} : vector<16x36xbf16>, vector<36x2304xbf16>, vector<16x2304xf32> -> vector<16x2304xf32>
    %c0_76 = arith.constant 0 : index
    %c0_77 = arith.constant 0 : index
    %57 = vector.load %arg3[%c0_76, %c0_77] : memref<1x2304xf32, #tpu.memory_space<vmem>>, vector<1x2304xf32>
    %58 = vector.broadcast %57 : vector<1x2304xf32> to vector<16x2304xf32>
    %59 = arith.mulf %56, %58 : vector<16x2304xf32>
    %cst_78 = arith.constant dense<0.000000e+00> : vector<16xf32>
    %60 = vector.multi_reduction <add>, %59, %cst_78 [1] : vector<16x2304xf32> to vector<16xf32>
    %61 = vector.shape_cast %60 : vector<16xf32> to vector<16x1xf32>
    %c0_79 = arith.constant 0 : index
    %c0_80 = arith.constant 0 : index
    %c0_81 = arith.constant 0 : index
    %c0_82 = arith.constant 0 : index
    %62 = vector.load %arg4[%c0_79, %c0_80, %c0_81, %c0_82] : memref<1x2x16x1xf32, #tpu.memory_space<vmem>>, vector<1x1x16x1xf32>
    %63 = vector.shape_cast %62 : vector<1x1x16x1xf32> to vector<16x1xf32>
    %64 = vector.shape_cast %61 : vector<16x1xf32> to vector<1x1x16x1xf32>
    tpu.vector_store %arg4[%c0_79, %c0_80, %c0_81, %c0_82], %64 {strides = array<i32>} : memref<1x2x16x1xf32, #tpu.memory_space<vmem>>, vector<1x1x16x1xf32>,
    %65 = arith.mulf %59, %56 : vector<16x2304xf32>
    %cst_83 = arith.constant dense<0.000000e+00> : vector<16xf32>
    %66 = vector.multi_reduction <add>, %65, %cst_83 [1] : vector<16x2304xf32> to vector<16xf32>
    %67 = vector.shape_cast %66 : vector<16xf32> to vector<16x1xf32>
    %c0_84 = arith.constant 0 : index
    %c1_85 = arith.constant 1 : index
    %c0_86 = arith.constant 0 : index
    %c0_87 = arith.constant 0 : index
    %68 = vector.load %arg4[%c0_84, %c1_85, %c0_86, %c0_87] : memref<1x2x16x1xf32, #tpu.memory_space<vmem>>, vector<1x1x16x1xf32>
    %69 = vector.shape_cast %68 : vector<1x1x16x1xf32> to vector<16x1xf32>
    %70 = vector.shape_cast %67 : vector<16x1xf32> to vector<1x1x16x1xf32>
    tpu.vector_store %arg4[%c0_84, %c1_85, %c0_86, %c0_87], %70 {strides = array<i32>} : memref<1x2x16x1xf32, #tpu.memory_space<vmem>>, vector<1x1x16x1xf32>,
    return
  }
  func.func @transform_0(%arg0: i32) -> (i32, i32, i32) {
    %c0_i32 = arith.constant 0 : i32
    %c0_i32_0 = arith.constant 0 : i32
    %c0_i32_1 = arith.constant 0 : i32
    return %arg0, %c0_i32, %c0_i32_0 : i32, i32, i32
  }
  func.func @transform_1(%arg0: i32) -> (i32, i32) {
    %c0_i32 = arith.constant 0 : i32
    %c0_i32_0 = arith.constant 0 : i32
    %c0_i32_1 = arith.constant 0 : i32
    return %c0_i32, %c0_i32_0 : i32, i32
  }
  func.func @transform_2(%arg0: i32) -> (i32, i32) {
    %c0_i32 = arith.constant 0 : i32
    %c0_i32_0 = arith.constant 0 : i32
    %c0_i32_1 = arith.constant 0 : i32
    return %c0_i32, %c0_i32_0 : i32, i32
  }
  func.func @transform_3(%arg0: i32) -> (i32, i32, i32, i32) {
    %c0_i32 = arith.constant 0 : i32
    %c0_i32_0 = arith.constant 0 : i32
    %c0_i32_1 = arith.constant 0 : i32
    %c0_i32_2 = arith.constant 0 : i32
    return %arg0, %c0_i32, %c0_i32_0, %c0_i32_1 : i32, i32, i32, i32
  }
}

</mosaic_0001>

<bundles_post_ra>
// kernel: tpu_custom_call.1
= control target key start
LH: loop header
LB: loop body
LE: loop exit
PB: predicated region body
PF: predicated region fallthrough
CT: control target
= control target key end

     0   :  { %8 = vsyncpa [#allocation4], 0  ;;  %s3356_s0 = inlined_call_operand.hbm [shape: bf16[2,4,1260], index: 0, kind: input, shape index: {}]   ;;  %s3357_s1 = inlined_call_operand.hbm [shape: bf16[16,36], index: 1, kind: input, shape index: {}]   ;;  %s3358_s2 = inlined_call_operand.hbm [shape: f32[1,2304], index: 2, kind: input, shape index: {}]   ;;  %s3359_s3 = inlined_call_operand.vmem [shape: f32[1,2,16,1], index: 3, kind: output, shape index: {}]  }
   0x1   :  { %9 = vsyncpa [#allocation6], 0  ;;  %s2657_s12 = smov [#allocation5]   ;;  %s2587_s16 = scalar_lea.hbm %s3357_s1, 128 }
   0x2   :  { %s27_s13 = sshll.u32 %s2657_s12, 4  ;;  %p2588_p0 = scmp.ne.s32.totalorder %s3357_s1, %s2587_s16  ;;  %s28_s13 = int_to_ptr.vmem [resolvable:$true] %s27_s13 }
   0x3   :  { %p2591_p1 = scmp.lt.u32.totalorder %s2587_s16, %s3357_s1 }
   0x5   :  { %p2593_p2 = pnand %p2591_p1, %p2588_p0 }
   0x7   :  { %2596 = shalt.err (!%p2593_p2)
}
   0x8   :  { %s2597_s21 = scalar_lea.vmem %s28_s13, 128  ;;  %p2602_p4 = scmp.lt.s32.totalorder %s28_s13, %s28_s13 }
   0x9   :  { %p2598_p3 = scmp.ne.s32.totalorder %s28_s13, %s2597_s21  ;;  %p2603_p5 = scmp.lt.s32.totalorder %s2597_s21, %s2597_s21 }
   0xb   :  { %p2604_p6 = por %p2603_p5, %p2602_p4 }
   0xd   :  { %p2605_p7 = pnand %p2604_p6, %p2598_p3 }
   0xf   :  { %2608 = shalt.err (!%p2605_p7)
}
  0x10   :  { %s2658_s22 = smov 64   ;;  %s2659_s23 = smov 4  }
  0x11   :  { %33 = dma.hbm_to_vmem [thread:$0]  %s3357_s1, 128, %s28_s13, [#allocation6], %s2658_s22, %s2658_s22, %s2659_s23  }
  0x12   :  { %s2660_s26 = smov [#allocation3]   ;;  %s2609_s30 = scalar_lea.hbm %s3356_s0, 640 }
  0x13   :  { %s15_s27 = sshll.u32 %s2660_s26, 4  ;;  %p2610_p8 = scmp.ne.s32.totalorder %s3356_s0, %s2609_s30  ;;  %s16_s27 = int_to_ptr.vmem [resolvable:$true] %s15_s27 }
  0x14   :  { %p2613_p9 = scmp.lt.u32.totalorder %s2609_s30, %s3356_s0 }
  0x16   :  { %p2615_p10 = pnand %p2613_p9, %p2610_p8 }
  0x18   :  { %2618 = shalt.err (!%p2615_p10)
}
  0x19   :  { %s2619_s8 = scalar_lea.vmem %s16_s27, 640  ;;  %p2624_p12 = scmp.lt.s32.totalorder %s16_s27, %s16_s27 }
  0x1a   :  { %p2620_p11 = scmp.ne.s32.totalorder %s16_s27, %s2619_s8  ;;  %p2625_p13 = scmp.lt.s32.totalorder %s2619_s8, %s2619_s8 }
  0x1c   :  { %p2626_p0 = por %p2625_p13, %p2624_p12 }
  0x1e   :  { %p2627_p1 = pnand %p2626_p0, %p2620_p11 }
  0x20   :  { %2630 = shalt.err (!%p2627_p1)
}
  0x21   :  { %s2661_s1 = smov 320   ;;  %s2662_s9 = smov 20  }
  0x22   :  { %21 = dma.hbm_to_vmem [thread:$0]  %s3356_s0, 640, %s16_s27, [#allocation4], %s2661_s1, %s2661_s1, %s2662_s9  }
  0x23   :  { %s2663_s12 = smov [#allocation7]   ;;  %s2631_s16 = scalar_lea.hbm %s3358_s2, 288 }
  0x24   :  { %s40_s13 = sshll.u32 %s2663_s12, 4  ;;  %p2632_p2 = scmp.ne.s32.totalorder %s3358_s2, %s2631_s16  ;;  %s41_s13 = int_to_ptr.vmem [resolvable:$true] %s40_s13 }
  0x25   :  { %p2635_p3 = scmp.lt.u32.totalorder %s2631_s16, %s3358_s2 }
  0x27   :  { %p2637_p4 = pnand %p2635_p3, %p2632_p2 }
  0x29   :  { %2640 = shalt.err (!%p2637_p4)
}
  0x2a   :  { %s2641_s21 = scalar_lea.vmem %s41_s13, 288  ;;  %p2646_p6 = scmp.lt.s32.totalorder %s41_s13, %s41_s13 }
  0x2b   :  { %p2642_p5 = scmp.ne.s32.totalorder %s41_s13, %s2641_s21  ;;  %p2647_p7 = scmp.lt.s32.totalorder %s2641_s21, %s2641_s21 }
  0x2d   :  { %p2648_p8 = por %p2647_p7, %p2646_p6 }
  0x2f   :  { %p2649_p9 = pnand %p2648_p8, %p2642_p5 }
  0x31   :  { %2652 = shalt.err (!%p2649_p9)
}
  0x32   :  { %43 = dma.hbm_to_vmem [thread:$0]  %s3358_s2, 288, %s41_s13, [#allocation6]  }
  0x33   :  { %2653 = dma.done.wait [#allocation4], 640  }
  0x34   :  { %2654 = vsyncadd [#allocation4], 4294966656 }
  0x35   :  { %2655 = dma.done.wait [#allocation6], 416  }
  0x36   :  { %2656 = vsyncadd [#allocation6], 4294966880  ;;  %v117_v0 = vlaneseq  ;;  %v2664_v1 = vmov 1983009808   ;;  %v187_v6 = vld [vmem:[#allocation3] sm:$0xff]  ;;  %v188_v7 = vld [vmem:[#allocation3 + $0x8] sm:$0xff] }
  0x37   :  { %v115_v2 = vunpack.c.l.s4 %v2664_v1  ;;  %v193_v9 = vcombine.high %v187_v6, %v187_v6  ;;  %2390 = vst.sshfl [vmem:[#allocation2] sm:$0xf pattern:$0x76325410] %v187_v6  ;;  %v208_v10 = vcombine.high %v188_v7, %v188_v7  ;;  %s2665_s2 = smov 126   ;;  %s2666_s23 = smov 127   ;;  %v113_v11 = vcombine.low %v187_v6, %v187_v6 }
  0x38   :  { %v2730_v3 = vshrl.u32 %v117_v0, 7  ;;  %2392 = vst.sshfl [vmem:[#allocation2 + $0x10] sm:$0xf pattern:$0x76325410] %v188_v7  ;;  %v2738_v12 = vld [vmem:[#allocation3 + $0x14] sm:$0xff]  ;;  %v128_v15 = vcombine.low %v188_v7, %v188_v7 }
  0x39   :  { %v116_v4 = vunpack.c.0.s8 %v115_v2  ;;  %2391 = vst.sshfl [vmem:[#allocation2 + $0x8] sm:$0xf pattern:$0x76325410] %v193_v9  ;;  %s2667_s24 = smov 92   ;;  %s2668_s25 = smov 91   ;;  %v796_v27 = vcombine.low %v2738_v12, %v2738_v12  ;;  %v874_v33 = vcombine.high %v2738_v12, %v2738_v12 }
  0x3a   :  { %2393 = vst.sshfl [vmem:[#allocation2 + $0x18] sm:$0xf pattern:$0x76325410] %v208_v10  ;;  %s2669_s26 = smov 90   ;;  %s2670_s27 = smov 56  }
  0x3b   :  { %v2733_v5 = vsub.s32 %v116_v4, %v2730_v3  ;;  %2399 = vst.sshfl [vmem:[#allocation2 + $0x24] sm:$0xf pattern:$0x76325410] %v2738_v12  ;;  %s2671_s28 = smov 55   ;;  %s2672_s29 = smov 54  }
  0x3c   :  { %v2673_v19 = vmov 0   ;;  %v2503_v20 = vld [vmem:[#allocation3 + $0x10] ss:$0 sps:$4 sm:$0xff]   ;;  %v869_v35 = vld [vmem:[#allocation3 + $0x1c] sm:$0xff]  ;;  %vm166_vm0 = vcmask 1043456   ;;  %vm246_vm1 = vcmask 1031168  }
  0x3d   :  { %v200_v8 = vrot.slane %v187_v6, %v2733_v5  ;;  %v207_v13 = vrot.slane %v193_v9, %v2733_v5  ;;  %v120_v14 = vrot.slane %v113_v11, %v2733_v5  ;;  %v215_v16 = vrot.slane %v188_v7, %v2733_v5  ;;  %1778 = vmatprep.mubr.bf16.mxu0 %v2673_v19  ;;  %v2504_v22 = vld [vmem:[#allocation3 + $0x10] ss:$0 sps:$4 sm:$0xff]   ;;  %v738_v39 = vld [vmem:[#allocation3 + $0x1c] sm:$0xff] }
  0x3e   :  { %v135_v17 = vrot.slane %v128_v15, %v2733_v5  ;;  %v222_v18 = vrot.slane %v208_v10, %v2733_v5  ;;  %1821 = vmatprep.mubr.bf16.mxu1 %v2673_v19  ;;  %v150_v21 = vrot.slane %v2503_v20, %v2733_v5  ;;  %v308_v23 = vrot.slane %v2504_v22, %v2733_v5  ;;  %v2394_v24 = vld.sshfl [vmem:[#allocation3 + $0x10] sm:$0x33 pattern:$0x76325410]  ;;  %v2511_v10 = vld [vmem:[#allocation3 + $0x24] ss:$0 sps:$4 sm:$0xff]  }
  0x3f   :  { %230 = vrot.lane.b32.xlu1 %v200_v8, %s2665_s2  ;;  %153 = vrot.lane.b32.xlu0 %v200_v8, %s2666_s23  ;;  %v2505_v25 = vld [vmem:[#allocation3 + $0x10] ss:$0 sps:$4 sm:$0xff]   ;;  %v803_v30 = vrot.slane %v796_v27, %v2733_v5  ;;  %v881_v32 = vrot.slane %v2738_v12, %v2733_v5  ;;  %v888_v34 = vrot.slane %v874_v33, %v2733_v5  ;;  %vm168_vm2 = vcmask 1039360  }
  0x40   :  { %v465_v26 = vrot.slane %v2505_v25, %v2733_v5  ;;  %v2507_v28 = vld [vmem:[#allocation3 + $0x10] ss:$0 sps:$4 sm:$0xff]   ;;  %v811_v36 = vcombine.low %v869_v35, %v869_v35  ;;  %2400 = vst.sshfl [vmem:[#allocation2 + $0x2c] sm:$0xf pattern:$0x76325410] %v874_v33  ;;  %v2813_v37 = vrot.slane %v869_v35, %v2733_v5  ;;  %v889_v40 = vcombine.high %v869_v35, %v869_v35 }
  0x41   :  { %v2389_v29 = vld.sshfl [vmem:[#allocation3 + $0x10] sm:$0x3 pattern:$0x76325410]  ;;  %v622_v31 = vrot.slane %v2507_v28, %v2733_v5  ;;  %vm403_vm3 = vcmask 744448   ;;  %vm325_vm4 = vcmask 752640   ;;  %v758_v6 = vcombine.high %v738_v39, %v738_v39 }
  0x42   :  { %106 = vst [vmem:[#allocation2 + $0x20] sm:$0x3] %v2389_v29  ;;  %v818_v38 = vrot.slane %v811_v36, %v2733_v5  ;;  %2401 = vst.sshfl [vmem:[#allocation2 + $0x34] sm:$0xf pattern:$0x76325410] %v738_v39  ;;  %v2827_v43 = vrot.slane %v889_v40, %v2733_v5 }
  0x43   :  { %311 = vrot.lane.b32.xlu1 %v200_v8, %s2667_s24  ;;  %387 = vrot.lane.b32.xlu0 %v200_v8, %s2668_s25  ;;  %vm482_vm5 = vcmask 736256   ;;  %v2398_v9 = vld.sshfl [vmem:[#allocation3 + $0x24] sm:$0x3 pattern:$0x76325410]  ;;  %vm560_vm6 = vcmask 457728  }
  0x44   :  { %2402 = vst.sshfl [vmem:[#allocation2 + $0x3c] sm:$0xf pattern:$0x76325410] %v758_v6  ;;  %789 = vst [vmem:[#allocation2 + $0x44] sm:$0x3] %v2398_v9 }
  0x45   :  { %vm639_vm7 = vcmask 449536   ;;  %v2516_v36 = vld [vmem:[#allocation3 + $0x24] ss:$0 sps:$4 sm:$0xff]   ;;  %vm717_vm8 = vcmask 441344   ;;  %vm1691_vm9 = vcmask 1041408   ;;  %vm1687_vm10 = vcmask 293888  }
  0x46   :  { %vm2303_vm11 = vcmask 7168  }
  0x47   :  { %232 = vrot.lane.b32.xlu1 %v207_v13, %s2665_s2  ;;  %151 = vrot.lane.b32.xlu0 %v120_v14, %s2666_s23 }
  0x4b   :  { %389 = vrot.lane.b32.xlu1 %v207_v13, %s2668_s25  ;;  %309 = vrot.lane.b32.xlu0 %v120_v14, %s2667_s24 }
  0x4f   :  { %468 = vrot.lane.b32.xlu1 %v200_v8, %s2669_s26  ;;  %466 = vrot.lane.b32.xlu0 %v120_v14, %s2669_s26 }
  0x53   :  { %546 = vrot.lane.b32.xlu1 %v207_v13, %s2670_s27  ;;  %544 = vrot.lane.b32.xlu0 %v200_v8, %s2670_s27 }
  0x57   :  { %625 = vrot.lane.b32.xlu1 %v200_v8, %s2671_s28  ;;  %623 = vrot.lane.b32.xlu0 %v120_v14, %s2671_s28 }
  0x5b   :  { %234 = vrot.lane.b32.xlu1 %v215_v16, %s2665_s2  ;;  %155 = vrot.lane.b32.xlu0 %v135_v17, %s2666_s23 }
  0x5f   :  { %701 = vrot.lane.b32.xlu1 %v200_v8, %s2672_s29  ;;  %313 = vrot.lane.b32.xlu0 %v135_v17, %s2667_s24 }
  0x63   :  { %157 = vrot.lane.b32.xlu1 %v215_v16, %s2666_s23  ;;  %703 = vrot.lane.b32.xlu0 %v207_v13, %s2672_s29 }
  0x67   :  { %315 = vrot.lane.b32.xlu1 %v215_v16, %s2667_s24  ;;  %236 = vrot.lane.b32.xlu0 %v222_v18, %s2665_s2 }
  0x6b   :  { %470 = vrot.lane.b32.xlu1 %v135_v17, %s2669_s26  ;;  %391 = vrot.lane.b32.xlu0 %v215_v16, %s2668_s25 }
  0x6f   :  { %627 = vrot.lane.b32.xlu1 %v135_v17, %s2671_s28  ;;  %548 = vrot.lane.b32.xlu0 %v215_v16, %s2670_s27  ;;  %v833_v17 = vrot.slane %v2511_v10, %v2733_v5 }
  0x73   :  { %472 = vrot.lane.b32.xlu1 %v215_v16, %s2669_s26  ;;  %393 = vrot.lane.b32.xlu0 %v222_v18, %s2668_s25 }
  0x77   :  { %629 = vrot.lane.b32.xlu1 %v215_v16, %s2671_s28  ;;  %550 = vrot.lane.b32.xlu0 %v222_v18, %s2670_s27 }
  0x7b   :  { %159 = vrot.lane.b32.xlu1 %v150_v21, %s2666_s23  ;;  %705 = vrot.lane.b32.xlu0 %v215_v16, %s2672_s29 }
  0x7f   :  { %317 = vrot.lane.b32.xlu1 %v308_v23, %s2667_s24  ;;  %238 = vrot.lane.b32.xlu0 %v2394_v24, %s2665_s2 }
  0x83   :  { %395 = vrot.lane.b32.xlu1 %v2394_v24, %s2668_s25  ;;  %707 = vrot.lane.b32.xlu0 %v222_v18, %s2672_s29  ;;  %v2515_v18 = vld [vmem:[#allocation3 + $0x24] ss:$0 sps:$4 sm:$0xff]  }
  0x84   :  { %v988_v28 = vrot.slane %v2515_v18, %v2733_v5 }
  0x87   :  { %552 = vrot.lane.b32.xlu1 %v2394_v24, %s2670_s27  ;;  %474 = vrot.lane.b32.xlu0 %v465_v26, %s2669_s26 }
  0x8b   :  { %834 = vrot.lane.b32.xlu1 %v803_v30, %s2666_s23  ;;  %631 = vrot.lane.b32.xlu0 %v622_v31, %s2671_s28 }
  0x8f   :  { %911 = vrot.lane.b32.xlu1 %v881_v32, %s2665_s2  ;;  %836 = vrot.lane.b32.xlu0 %v881_v32, %s2666_s23 }
  0x93   :  { %989 = vrot.lane.b32.xlu1 %v803_v30, %s2667_s24  ;;  %913 = vrot.lane.b32.xlu0 %v888_v34, %s2665_s2 }
  0x97   :  { %709 = vrot.lane.b32.xlu1 %v2394_v24, %s2672_s29  ;;  %991 = vrot.lane.b32.xlu0 %v881_v32, %s2667_s24 }
  0x9b   :  { %1068 = vrot.lane.b32.xlu1 %v888_v34, %s2668_s25  ;;  %1066 = vrot.lane.b32.xlu0 %v881_v32, %s2668_s25 }
  0x9f   :  { %1146 = vrot.lane.b32.xlu1 %v881_v32, %s2669_s26  ;;  %1144 = vrot.lane.b32.xlu0 %v803_v30, %s2669_s26 }
  0xa3   :  { %1223 = vrot.lane.b32.xlu1 %v888_v34, %s2670_s27  ;;  %1221 = vrot.lane.b32.xlu0 %v881_v32, %s2670_s27 }
  0xa7   :  { %1301 = vrot.lane.b32.xlu1 %v881_v32, %s2671_s28  ;;  %1299 = vrot.lane.b32.xlu0 %v803_v30, %s2671_s28  ;;  %v2403_v30 = vld.sshfl [vmem:[#allocation3 + $0x24] sm:$0x33 pattern:$0x76325410] }
  0xab   :  { %915 = vrot.lane.b32.xlu1 %v2813_v37, %s2665_s2  ;;  %838 = vrot.lane.b32.xlu0 %v818_v38, %s2666_s23 }
  0xaf   :  { %1376 = vrot.lane.b32.xlu1 %v881_v32, %s2672_s29  ;;  %993 = vrot.lane.b32.xlu0 %v818_v38, %s2667_s24 }
  0xb1   :  { %v231_v41 = vpop.permute.xlu1 %230  ;;  %v2821_v42 = vpop.permute.xlu0 %153 }
  0xb2   :  { %v240_v48 = vrot.slane %v231_v41, 4  ;;  %v162_v49 = vrot.slane %v2821_v42, 4 }
  0xb3   :  { %840 = vrot.lane.b32.xlu1 %v2813_v37, %s2666_s23  ;;  %1378 = vrot.lane.b32.xlu0 %v888_v34, %s2672_s29 }
  0xb5   :  { %v2829_v44 = vpop.permute.xlu1 %311  ;;  %v388_v45 = vpop.permute.xlu0 %387 }
  0xb6   :  { %v320_v58 = vrot.slane %v2829_v44, 4  ;;  %v397_v59 = vrot.slane %v388_v45, 4 }
  0xb7   :  { %995 = vrot.lane.b32.xlu1 %v2813_v37, %s2667_s24  ;;  %917 = vrot.lane.b32.xlu0 %v2827_v43, %s2665_s2 }
  0xb9   :  { %v2835_v46 = vpop.permute.xlu1 %232  ;;  %v152_v47 = vpop.permute.xlu0 %151 }
  0xba   :  { %v241_v50 = vrot.slane %v2835_v46, 4  ;;  %v161_v51 = vrot.slane %v152_v47, 4 }
  0xbb   :  { %1148 = vrot.lane.b32.xlu1 %v818_v38, %s2669_s26  ;;  %1070 = vrot.lane.b32.xlu0 %v2813_v37, %s2668_s25 }
  0xbc   :  { %v245_v52 = vsel %vm166_vm0, %v240_v48, %v241_v50  ;;  %v167_v53 = vsel %vm166_vm0, %v161_v51, %v162_v49  ;;  %v1143_v48 = vrot.slane %v2516_v36, %v2733_v5 }
  0xbd   :  { %v247_v54 = vsel %vm246_vm1, %v231_v41, %v245_v52  ;;  %v169_v55 = vsel %vm168_vm2, %v152_v47, %v167_v53  ;;  %v2850_v56 = vpop.permute.xlu1 %389  ;;  %v310_v57 = vpop.permute.xlu0 %309 }
  0xbe   :  { %260 = vst [vmem:[#allocation2 + $0x48] sm:$0x33] %v247_v54  ;;  %182 = vst [vmem:[#allocation2] sm:$0xcc] %v169_v55  ;;  %v398_v60 = vrot.slane %v2850_v56, 4  ;;  %v319_v61 = vrot.slane %v310_v57, 4 }
  0xbf   :  { %1303 = vrot.lane.b32.xlu1 %v818_v38, %s2671_s28  ;;  %1225 = vrot.lane.b32.xlu0 %v2813_v37, %s2670_s27 }
  0xc0   :  { %v402_v62 = vsel %vm166_vm0, %v397_v59, %v398_v60  ;;  %v324_v63 = vsel %vm166_vm0, %v319_v61, %v320_v58 }
  0xc1   :  { %v404_v0 = vsel %vm403_vm3, %v388_v45, %v402_v62  ;;  %v326_v1 = vsel %vm325_vm4, %v310_v57, %v324_v63  ;;  %v2865_v2 = vpop.permute.xlu1 %468  ;;  %v467_v4 = vpop.permute.xlu0 %466 }
  0xc2   :  { %417 = vst [vmem:[#allocation2 + $0x90] sm:$0x33] %v404_v0  ;;  %339 = vst [vmem:[#allocation2 + $0x48] sm:$0xcc] %v326_v1  ;;  %v477_v7 = vrot.slane %v2865_v2, 4  ;;  %v476_v8 = vrot.slane %v467_v4, 4 }
  0xc3   :  { %1150 = vrot.lane.b32.xlu1 %v2813_v37, %s2669_s26  ;;  %1072 = vrot.lane.b32.xlu0 %v2827_v43, %s2668_s25 }
  0xc4   :  { %v481_v11 = vsel %vm166_vm0, %v476_v8, %v477_v7 }
  0xc5   :  { %v483_v12 = vsel %vm482_vm5, %v467_v4, %v481_v11  ;;  %v2876_v13 = vpop.permute.xlu1 %546  ;;  %v545_v14 = vpop.permute.xlu0 %544 }
  0xc6   :  { %496 = vst [vmem:[#allocation2 + $0x90] sm:$0xcc] %v483_v12  ;;  %v555_v15 = vrot.slane %v2876_v13, 4  ;;  %v554_v16 = vrot.slane %v545_v14, 4 }
  0xc7   :  { %1305 = vrot.lane.b32.xlu1 %v2813_v37, %s2671_s28  ;;  %1227 = vrot.lane.b32.xlu0 %v2827_v43, %s2670_s27 }
  0xc8   :  { %v559_v20 = vsel %vm166_vm0, %v554_v16, %v555_v15 }
  0xc9   :  { %v561_v21 = vsel %vm560_vm6, %v545_v14, %v559_v20  ;;  %v2888_v22 = vpop.permute.xlu1 %625  ;;  %v624_v23 = vpop.permute.xlu0 %623  ;;  %v2512_v24 = vld [vmem:[#allocation2 + $0x4] ss:$72 sps:$4 sm:$0xff]   ;;  %v2514_v25 = vld [vmem:[#allocation2] ss:$72 sps:$4 sm:$0xff]  }
  0xca   :  { %574 = vst [vmem:[#allocation2 + $0xd8] sm:$0x33] %v561_v21  ;;  %v634_v26 = vrot.slane %v2888_v22, 4  ;;  %v633_v27 = vrot.slane %v624_v23, 4  ;;  %1746 = vmatprep.subr.bf16.mxu0 %v2512_v24 }
  0xcb   :  { %842 = vrot.lane.b32.xlu1 %v833_v17, %s2666_s23  ;;  %1380 = vrot.lane.b32.xlu0 %v2813_v37, %s2672_s29 }
  0xcc   :  { %v638_v29 = vsel %vm166_vm0, %v633_v27, %v634_v26  ;;  %1747 = vmatpush1.bf16.msra.mxu0 %v2514_v25 }
  0xcd   :  { %v640_v31 = vsel %vm639_vm7, %v624_v23, %v638_v29  ;;  %v235_v32 = vpop.permute.xlu1 %234  ;;  %v156_v33 = vpop.permute.xlu0 %155 }
  0xce   :  { %653 = vst [vmem:[#allocation2 + $0xd8] sm:$0xcc] %v640_v31  ;;  %v242_v34 = vrot.slane %v235_v32, 4  ;;  %v163_v35 = vrot.slane %v156_v33, 4 }
  0xcf   :  { %997 = vrot.lane.b32.xlu1 %v988_v28, %s2667_s24  ;;  %919 = vrot.lane.b32.xlu0 %v2403_v30, %s2665_s2 }
  0xd0   :  { %v248_v37 = vsel %vm166_vm0, %v241_v50, %v242_v34  ;;  %v170_v38 = vsel %vm166_vm0, %v162_v49, %v163_v35  ;;  %v2520_v50 = vld [vmem:[#allocation3 + $0x24] ss:$0 sps:$4 sm:$0xff]  }
  0xd1   :  { %v249_v39 = vsel %vm246_vm1, %v2835_v46, %v248_v37  ;;  %v171_v40 = vsel %vm168_vm2, %v2821_v42, %v170_v38  ;;  %v702_v41 = vpop.permute.xlu1 %701  ;;  %v314_v45 = vpop.permute.xlu0 %313  ;;  %v1298_v57 = vrot.slane %v2520_v50, %v2733_v5 }
  0xd2   :  { %261 = vst [vmem:[#allocation2 + $0x50] sm:$0x33] %v249_v39  ;;  %183 = vst [vmem:[#allocation2 + $0x8] sm:$0xcc] %v171_v40  ;;  %v321_v47 = vrot.slane %v314_v45, 4  ;;  %v711_v49 = vrot.slane %v702_v41, 4 }
  0xd3   :  { %1074 = vrot.lane.b32.xlu1 %v2403_v30, %s2668_s25  ;;  %1382 = vrot.lane.b32.xlu0 %v2827_v43, %s2672_s29 }
  0xd4   :  { %v327_v46 = vsel %vm166_vm0, %v320_v58, %v321_v47 }
  0xd5   :  { %v328_v42 = vsel %vm325_vm4, %v2829_v44, %v327_v46  ;;  %v2920_v51 = vpop.permute.xlu1 %157  ;;  %v2922_v52 = vpop.permute.xlu0 %703  ;;  %v2517_v53 = vld [vmem:[#allocation2 + $0x94] ss:$72 sps:$4 sm:$0xff]   ;;  %v2519_v54 = vld [vmem:[#allocation2 + $0x90] ss:$72 sps:$4 sm:$0xff]  }
  0xd6   :  { %340 = vst [vmem:[#allocation2 + $0x50] sm:$0xcc] %v328_v42  ;;  %v164_v43 = vrot.slane %v2920_v51, 4  ;;  %v712_v55 = vrot.slane %v2922_v52, 4  ;;  %1748 = vmatprep.subr.bf16.mxu0 %v2517_v53 }
  0xd7   :  { %1229 = vrot.lane.b32.xlu1 %v2403_v30, %s2670_s27  ;;  %1152 = vrot.lane.b32.xlu0 %v1143_v48, %s2669_s26 }
  0xd8   :  { %v172_v44 = vsel %vm166_vm0, %v163_v35, %v164_v43  ;;  %v716_v58 = vsel %vm166_vm0, %v711_v49, %v712_v55  ;;  %1749 = vmatpush1.bf16.msra.mxu0 %v2519_v54 }
  0xd9   :  { %v173_v59 = vsel %vm168_vm2, %v156_v33, %v172_v44  ;;  %v718_v61 = vsel %vm717_vm8, %v702_v41, %v716_v58  ;;  %v2937_v62 = vpop.permute.xlu1 %315  ;;  %v2939_v63 = vpop.permute.xlu0 %236 }
  0xda   :  { %184 = vst [vmem:[#allocation2 + $0x10] sm:$0xcc] %v173_v59  ;;  %731 = vst [vmem:[#allocation2 + $0x120] sm:$0x33] %v718_v61  ;;  %v322_v5 = vrot.slane %v2937_v62, 4  ;;  %v243_v0 = vrot.slane %v2939_v63, 4 }
  0xdb   :  { %1384 = vrot.lane.b32.xlu1 %v2403_v30, %s2672_s29  ;;  %1307 = vrot.lane.b32.xlu0 %v1298_v57, %s2671_s28  ;;  %v2971_v30 = vld [vmem:[#allocation5] sm:$0xff]  }
  0xdc   :  { %v329_v1 = vsel %vm166_vm0, %v321_v47, %v322_v5  ;;  %v250_v4 = vsel %vm166_vm0, %v242_v34, %v243_v0 }
  0xdd   :  { %v330_v6 = vsel %vm325_vm4, %v314_v45, %v329_v1  ;;  %v251_v8 = vsel %vm246_vm1, %v235_v32, %v250_v4  ;;  %v471_v9 = vpop.permute.xlu1 %470  ;;  %v392_v10 = vpop.permute.xlu0 %391  ;;  %v2521_v11 = vld [vmem:[#allocation2 + $0xc] ss:$72 sps:$4 sm:$0xff]   ;;  %v2523_v12 = vld [vmem:[#allocation2 + $0x8] ss:$72 sps:$4 sm:$0xff]  }
  0xde   :  { %341 = vst [vmem:[#allocation2 + $0x58] sm:$0xcc] %v330_v6  ;;  %262 = vst [vmem:[#allocation2 + $0x58] sm:$0x33] %v251_v8  ;;  %v478_v14 = vrot.slane %v471_v9, 4  ;;  %v399_v16 = vrot.slane %v392_v10, 4  ;;  %1789 = vmatprep.subr.bf16.mxu1 %v2521_v11 }
  0xdf   :  { %1790 = vmatpush1.bf16.msra.mxu1 %v2523_v12 }
  0xe0   :  { %v484_v17 = vsel %vm166_vm0, %v477_v7, %v478_v14  ;;  %v405_v18 = vsel %vm166_vm0, %v398_v60, %v399_v16 }
  0xe1   :  { %v485_v20 = vsel %vm482_vm5, %v2865_v2, %v484_v17  ;;  %v406_v21 = vsel %vm403_vm3, %v2850_v56, %v405_v18  ;;  %v628_v23 = vpop.permute.xlu1 %627  ;;  %v549_v24 = vpop.permute.xlu0 %548  ;;  %v1448_v25 = vld [vmem:[#allocation2 + $0x120] sm:$0x33] }
  0xe2   :  { %497 = vst [vmem:[#allocation2 + $0x98] sm:$0xcc] %v485_v20  ;;  %418 = vst [vmem:[#allocation2 + $0x98] sm:$0x33] %v406_v21  ;;  %v635_v27 = vrot.slane %v628_v23, 4  ;;  %v556_v28 = vrot.slane %v549_v24, 4  ;;  %v2445_v7 = vcombine.high %v1448_v25, %v1448_v25  ;;  %v2444_v29 = vcombine.low %v1448_v25, %v1448_v25 }
  0xe4   :  { %v641_v60 = vsel %vm166_vm0, %v634_v26, %v635_v27  ;;  %v562_v2 = vsel %vm166_vm0, %v555_v15, %v556_v28  ;;  %2462 = vmatprep.subr.msk.bf16.mxu0 %vm1691_vm9, %v2445_v7  ;;  %v1693_v56 = vsel %vm1691_vm9, %v2444_v29, 0 }
  0xe5   :  { %v642_v31 = vsel %vm639_vm7, %v2888_v22, %v641_v60  ;;  %v563_v32 = vsel %vm560_vm6, %v2876_v13, %v562_v2  ;;  %v2977_v33 = vpop.permute.xlu1 %472  ;;  %v2979_v34 = vpop.permute.xlu0 %393  ;;  %1751 = vmatpush1.bf16.msra.mxu0 %v1693_v56  ;;  %v2528_v26 = vld [vmem:[#allocation2 + $0x14] ss:$72 sps:$4 sm:$0xff]   ;;  %v2526_v36 = vld [vmem:[#allocation2 + $0x10] ss:$72 sps:$4 sm:$0xff]  }
  0xe6   :  { %654 = vst [vmem:[#allocation2 + $0xe0] sm:$0xcc] %v642_v31  ;;  %575 = vst [vmem:[#allocation2 + $0xe0] sm:$0x33] %v563_v32  ;;  %v479_v15 = vrot.slane %v2977_v33, 4  ;;  %v400_v35 = vrot.slane %v2979_v34, 4  ;;  %1832 = vmatprep.subr.bf16.mxu0 %v2528_v26 }
  0xe8   :  { %v486_v22 = vsel %vm166_vm0, %v478_v14, %v479_v15  ;;  %v407_v13 = vsel %vm166_vm0, %v399_v16, %v400_v35  ;;  %2463 = vmatmul.mubr.msk.bf16.vlgmr.msra.gmra.mrb[0].mxu0 %vm1687_vm10, %v2971_v30 }
  0xe9   :  { %v487_v37 = vsel %vm482_vm5, %v471_v9, %v486_v22  ;;  %v408_v38 = vsel %vm403_vm3, %v392_v10, %v407_v13  ;;  %v2991_v39 = vpop.permute.xlu1 %629  ;;  %v2993_v40 = vpop.permute.xlu0 %550  ;;  %1833 = vmatpush1.bf16.msra.mxu0 %v2526_v36  ;;  %1864 = vmatprep.mubr.bf16.mxu0 %v2673_v19 }
  0xea   :  { %498 = vst [vmem:[#allocation2 + $0xa0] sm:$0xcc] %v487_v37  ;;  %419 = vst [vmem:[#allocation2 + $0xa0] sm:$0x33] %v408_v38  ;;  %v636_v41 = vrot.slane %v2991_v39, 4  ;;  %v557_v45 = vrot.slane %v2993_v40, 4 }
  0xec   :  { %v643_v47 = vsel %vm166_vm0, %v635_v27, %v636_v41  ;;  %v564_v48 = vsel %vm166_vm0, %v556_v28, %v557_v45 }
  0xed   :  { %v644_v50 = vsel %vm639_vm7, %v628_v23, %v643_v47  ;;  %v565_v49 = vsel %vm560_vm6, %v549_v24, %v564_v48  ;;  %v160_v46 = vpop.permute.xlu1 %159  ;;  %v706_v42 = vpop.permute.xlu0 %705  ;;  %v2530_v53 = vld [vmem:[#allocation2 + $0x9c] ss:$72 sps:$4 sm:$0xff]   ;;  %v2532_v54 = vld [vmem:[#allocation2 + $0x98] ss:$72 sps:$4 sm:$0xff]  }
  0xee   :  { %655 = vst [vmem:[#allocation2 + $0xe8] sm:$0xcc] %v644_v50  ;;  %576 = vst [vmem:[#allocation2 + $0xe8] sm:$0x33] %v565_v49  ;;  %v165_v57 = vrot.slane %v160_v46, 4  ;;  %v713_v44 = vrot.slane %v706_v42, 4  ;;  %1791 = vmatprep.subr.bf16.mxu1 %v2530_v53 }
  0xef   :  { %1792 = vmatpush1.bf16.msra.mxu1 %v2532_v54 }
  0xf0   :  { %v174_v58 = vsel %vm166_vm0, %v164_v43, %v165_v57  ;;  %v176_v59 = vsel %vm168_vm2, %v160_v46, %v165_v57  ;;  %v719_v61 = vsel %vm166_vm0, %v712_v55, %v713_v44 }
  0xf1   :  { %v175_v1 = vsel %vm168_vm2, %v2920_v51, %v174_v58  ;;  %186 = vst [vmem:[#allocation2 + $0x20] sm:$0xc] %v176_v59  ;;  %v720_v4 = vsel %vm717_vm8, %v2922_v52, %v719_v61  ;;  %v318_v6 = vpop.permute.xlu1 %317  ;;  %v239_v8 = vpop.permute.xlu0 %238 }
  0xf2   :  { %185 = vst [vmem:[#allocation2 + $0x18] sm:$0xcc] %v175_v1  ;;  %732 = vst [vmem:[#allocation2 + $0x128] sm:$0x33] %v720_v4  ;;  %v323_v9 = vrot.slane %v318_v6, 4  ;;  %v244_v43 = vrot.slane %v239_v8, 4 }
  0xf4   :  { %v331_v10 = vsel %vm166_vm0, %v322_v5, %v323_v9  ;;  %v333_v55 = vsel %vm325_vm4, %v318_v6, %v323_v9  ;;  %v252_v51 = vsel %vm166_vm0, %v243_v0, %v244_v43  ;;  %v254_v11 = vsel %vm246_vm1, %v239_v8, %v244_v43 }
  0xf5   :  { %v332_v52 = vsel %vm325_vm4, %v2937_v62, %v331_v10  ;;  %343 = vst [vmem:[#allocation2 + $0x68] sm:$0xc] %v333_v55  ;;  %v253_v12 = vsel %vm246_vm1, %v2939_v63, %v252_v51  ;;  %264 = vst [vmem:[#allocation2 + $0x68] sm:$0x3] %v254_v11  ;;  %v396_v14 = vpop.permute.xlu1 %395  ;;  %v3027_v16 = vpop.permute.xlu0 %707  ;;  %v2533_v5 = vld [vmem:[#allocation2 + $0xa0] ss:$72 sps:$4 sm:$0xff]  }
  0xf6   :  { %v2535_v17 = vld [vmem:[#allocation2 + $0xa4] ss:$72 sps:$4 sm:$0xff]   ;;  %342 = vst [vmem:[#allocation2 + $0x60] sm:$0xcc] %v332_v52  ;;  %263 = vst [vmem:[#allocation2 + $0x60] sm:$0x33] %v253_v12 }
  0xf7   :  { %v401_v18 = vrot.slane %v396_v14, 4  ;;  %v714_v0 = vrot.slane %v3027_v16, 4  ;;  %1834 = vmatprep.subr.bf16.mxu0 %v2535_v17 }
  0xf8   :  { %1835 = vmatpush1.bf16.msra.mxu0 %v2533_v5 }
  0xf9   :  { %v409_v20 = vsel %vm166_vm0, %v400_v35, %v401_v18  ;;  %v411_v62 = vsel %vm403_vm3, %v396_v14, %v401_v18  ;;  %v721_v63 = vsel %vm166_vm0, %v713_v44, %v714_v0  ;;  %v553_v24 = vpop.permute.xlu1 %552  ;;  %v475_v25 = vpop.permute.xlu0 %474  ;;  %v1449_v27 = vld [vmem:[#allocation2 + $0x128] sm:$0x33] }
  0xfa   :  { %v410_v21 = vsel %vm403_vm3, %v2979_v34, %v409_v20  ;;  %421 = vst [vmem:[#allocation2 + $0xb0] sm:$0x3] %v411_v62  ;;  %v722_v23 = vsel %vm717_vm8, %v706_v42, %v721_v63  ;;  %v558_v28 = vrot.slane %v553_v24, 4  ;;  %v480_v7 = vrot.slane %v475_v25, 4 }
  0xfb   :  { %420 = vst [vmem:[#allocation2 + $0xa8] sm:$0x33] %v410_v21  ;;  %733 = vst [vmem:[#allocation2 + $0x130] sm:$0x33] %v722_v23  ;;  %v2447_v29 = vcombine.high %v1449_v27, %v1449_v27  ;;  %v2446_v60 = vcombine.low %v1449_v27, %v1449_v27 }
  0xfc   :  { %v566_v2 = vsel %vm166_vm0, %v557_v45, %v558_v28  ;;  %v568_v56 = vsel %vm560_vm6, %v553_v24, %v558_v28  ;;  %v488_v31 = vsel %vm166_vm0, %v479_v15, %v480_v7  ;;  %v490_v32 = vsel %vm482_vm5, %v475_v25, %v480_v7  ;;  %v2547_v7 = vld [vmem:[#allocation2 + $0x20] ss:$72 sps:$4 sm:$0xff]  }
  0xfd   :  { %2464 = vmatprep.subr.msk.bf16.mxu1 %vm1691_vm9, %v2447_v29  ;;  %v567_v34 = vsel %vm560_vm6, %v2993_v40, %v566_v2  ;;  %578 = vst [vmem:[#allocation2 + $0xf8] sm:$0x3] %v568_v56  ;;  %v489_v26 = vsel %vm482_vm5, %v2977_v33, %v488_v31  ;;  %500 = vst [vmem:[#allocation2 + $0xb0] sm:$0xc] %v490_v32  ;;  %v835_v35 = vpop.permute.xlu1 %834  ;;  %v632_v36 = vpop.permute.xlu0 %631  ;;  %v1699_v22 = vsel %vm1691_vm9, %v2446_v60, 0 }
  0xfe   :  { %v2540_v13 = vld [vmem:[#allocation2 + $0x1c] ss:$72 sps:$4 sm:$0xff]   ;;  %577 = vst [vmem:[#allocation2 + $0xf0] sm:$0x33] %v567_v34  ;;  %499 = vst [vmem:[#allocation2 + $0xa8] sm:$0xcc] %v489_v26  ;;  %1794 = vmatpush1.bf16.msra.mxu1 %v1699_v22 }
  0xff   :  { %v637_v15 = vrot.slane %v632_v36, 4  ;;  %1875 = vmatprep.subr.bf16.mxu1 %v2540_v13  ;;  %v844_v37 = vrot.slane %v835_v35, 4  ;;  %v2538_v45 = vld [vmem:[#allocation2 + $0x18] ss:$72 sps:$4 sm:$0xff]  }
 0x101   :  { %v645_v38 = vsel %vm166_vm0, %v636_v41, %v637_v15  ;;  %v647_v40 = vsel %vm639_vm7, %v632_v36, %v637_v15  ;;  %v912_v47 = vpop.permute.xlu1 %911  ;;  %v3056_v48 = vpop.permute.xlu0 %836  ;;  %2465 = vmatmul.mubr.msk.bf16.vlgmr.msra.gmra.mrb[0].mxu1 %vm1687_vm10, %v2971_v30 }
 0x102   :  { %v646_v33 = vsel %vm639_vm7, %v2991_v39, %v645_v38  ;;  %657 = vst [vmem:[#allocation2 + $0xf8] sm:$0xc] %v647_v40  ;;  %v1450_v50 = vld [vmem:[#allocation2 + $0x130] sm:$0x33]  ;;  %v845_v49 = vrot.slane %v3056_v48, 4  ;;  %1876 = vmatpush1.bf16.msra.mxu1 %v2538_v45  ;;  %1907 = vmatprep.mubr.bf16.mxu1 %v2673_v19  ;;  %v921_v42 = vrot.slane %v912_v47, 4 }
 0x103   :  { %656 = vst [vmem:[#allocation2 + $0xf0] sm:$0xcc] %v646_v33  ;;  %v2449_v46 = vcombine.high %v1450_v50, %v1450_v50  ;;  %v2448_v41 = vcombine.low %v1450_v50, %v1450_v50 }
 0x104   :  { %v849_v39 = vsel %vm166_vm0, %v844_v37, %v845_v49 }
 0x105   :  { %2466 = vmatprep.subr.msk.bf16.mxu0 %vm1691_vm9, %v2449_v46  ;;  %v1705_v53 = vsel %vm1691_vm9, %v2448_v41, 0  ;;  %v850_v54 = vsel %vm168_vm2, %v835_v35, %v849_v39  ;;  %v990_v57 = vpop.permute.xlu1 %989  ;;  %v3068_v44 = vpop.permute.xlu0 %913 }
 0x106   :  { %1837 = vmatpush1.bf16.msra.mxu0 %v1705_v53  ;;  %863 = vst [vmem:[#allocation2 + $0x24] sm:$0xcc] %v850_v54  ;;  %v922_v58 = vrot.slane %v3068_v44, 4  ;;  %v999_v59 = vrot.slane %v990_v57, 4 }
 0x108   :  { %v926_v61 = vsel %vm166_vm0, %v921_v42, %v922_v58 }
 0x109   :  { %2467 = vmatmul.mubr.msk.bf16.vlgmr.msra.gmra.mrb[4].mxu0 %vm1687_vm10, %v2971_v30  ;;  %v927_v1 = vsel %vm246_vm1, %v912_v47, %v926_v61  ;;  %v710_v4 = vpop.permute.xlu1 %709  ;;  %v3077_v6 = vpop.permute.xlu0 %991 }
 0x10a   :  { %v2543_v8 = vld [vmem:[#allocation2 + $0xa8] ss:$72 sps:$4 sm:$0xff]   ;;  %v2545_v9 = vld [vmem:[#allocation2 + $0xac] ss:$72 sps:$4 sm:$0xff]   ;;  %1950 = vmatprep.mubr.bf16.mxu0 %v2673_v19  ;;  %940 = vst [vmem:[#allocation2 + $0x6c] sm:$0x33] %v927_v1 }
 0x10b   :  { %v715_v43 = vrot.slane %v710_v4, 4  ;;  %v1000_v10 = vrot.slane %v3077_v6, 4  ;;  %1877 = vmatprep.subr.bf16.mxu1 %v2545_v9 }
 0x10c   :  { %1878 = vmatpush1.bf16.msra.mxu1 %v2543_v8 }
 0x10d   :  { %v723_v55 = vsel %vm166_vm0, %v714_v0, %v715_v43  ;;  %v725_v51 = vsel %vm717_vm8, %v710_v4, %v715_v43  ;;  %v1004_v11 = vsel %vm166_vm0, %v999_v59, %v1000_v10  ;;  %v3091_v14 = vpop.permute.xlu1 %1068  ;;  %v1067_v5 = vpop.permute.xlu0 %1066 }
 0x10e   :  { %v724_v52 = vsel %vm717_vm8, %v3027_v16, %v723_v55  ;;  %735 = vst [vmem:[#allocation2 + $0x140] sm:$0x3] %v725_v51  ;;  %v1005_v12 = vsel %vm325_vm4, %v990_v57, %v1004_v11  ;;  %v1077_v17 = vrot.slane %v3091_v14, 4  ;;  %v1076_v18 = vrot.slane %v1067_v5, 4 }
 0x10f   :  { %734 = vst [vmem:[#allocation2 + $0x138] sm:$0x33] %v724_v52  ;;  %1018 = vst [vmem:[#allocation2 + $0x6c] sm:$0xcc] %v1005_v12 }
 0x110   :  { %v1081_v0 = vsel %vm166_vm0, %v1076_v18, %v1077_v17 }
 0x111   :  { %v1082_v20 = vsel %vm403_vm3, %v1067_v5, %v1081_v0  ;;  %v3098_v62 = vpop.permute.xlu1 %1146  ;;  %v1145_v16 = vpop.permute.xlu0 %1144 }
 0x112   :  { %1095 = vst [vmem:[#allocation2 + $0xb4] sm:$0x33] %v1082_v20  ;;  %v1155_v63 = vrot.slane %v3098_v62, 4  ;;  %v1154_v21 = vrot.slane %v1145_v16, 4 }
 0x114   :  { %v1159_v23 = vsel %vm166_vm0, %v1154_v21, %v1155_v63 }
 0x115   :  { %v1160_v24 = vsel %vm482_vm5, %v1145_v16, %v1159_v23  ;;  %v3105_v25 = vpop.permute.xlu1 %1223  ;;  %v1222_v27 = vpop.permute.xlu0 %1221 }
 0x116   :  { %v1451_v28 = vld [vmem:[#allocation2 + $0x138] sm:$0x33]  ;;  %1173 = vst [vmem:[#allocation2 + $0xb4] sm:$0xcc] %v1160_v24  ;;  %v1232_v29 = vrot.slane %v3105_v25, 4  ;;  %v1231_v60 = vrot.slane %v1222_v27, 4 }
 0x117   :  { %v2451_v2 = vcombine.high %v1451_v28, %v1451_v28  ;;  %v2549_v56 = vld [vmem:[#allocation2 + $0x24] ss:$72 sps:$4 sm:$0xff]   ;;  %v2450_v31 = vcombine.low %v1451_v28, %v1451_v28  ;;  %v2553_v20 = vld [vmem:[#allocation2 + $0x28] ss:$72 sps:$4 sm:$0xff]  }
 0x118   :  { %v1236_v32 = vsel %vm166_vm0, %v1231_v60, %v1232_v29  ;;  %1918 = vmatprep.subr.bf16.mxu0 %v2549_v56 }
 0x119   :  { %2468 = vmatprep.subr.msk.bf16.mxu1 %vm1691_vm9, %v2451_v2  ;;  %v1711_v34 = vsel %vm1691_vm9, %v2450_v31, 0  ;;  %v1237_v26 = vsel %vm560_vm6, %v1222_v27, %v1236_v32  ;;  %v3114_v35 = vpop.permute.xlu1 %1301  ;;  %v1300_v36 = vpop.permute.xlu0 %1299  ;;  %1919 = vmatpush1.bf16.msra.mxu0 %v2547_v7 }
 0x11a   :  { %1880 = vmatpush1.bf16.msra.mxu1 %v1711_v34  ;;  %1250 = vst [vmem:[#allocation2 + $0xfc] sm:$0x33] %v1237_v26  ;;  %v1310_v22 = vrot.slane %v3114_v35, 4  ;;  %v1309_v13 = vrot.slane %v1300_v36, 4 }
 0x11c   :  { %v1314_v15 = vsel %vm166_vm0, %v1309_v13, %v1310_v22 }
 0x11d   :  { %2469 = vmatmul.mubr.msk.bf16.vlgmr.msra.gmra.mrb[4].mxu1 %vm1687_vm10, %v2971_v30  ;;  %v1315_v37 = vsel %vm639_vm7, %v1300_v36, %v1314_v15  ;;  %v916_v38 = vpop.permute.xlu1 %915  ;;  %v839_v40 = vpop.permute.xlu0 %838 }
 0x11e   :  { %1993 = vmatprep.mubr.bf16.mxu1 %v2673_v19  ;;  %1328 = vst [vmem:[#allocation2 + $0xfc] sm:$0xcc] %v1315_v37  ;;  %v923_v45 = vrot.slane %v916_v38, 4  ;;  %v846_v33 = vrot.slane %v839_v40, 4 }
 0x120   :  { %v928_v47 = vsel %vm166_vm0, %v922_v58, %v923_v45  ;;  %v851_v50 = vsel %vm166_vm0, %v845_v49, %v846_v33 }
 0x121   :  { %v929_v46 = vsel %vm246_vm1, %v3068_v44, %v928_v47  ;;  %v852_v41 = vsel %vm168_vm2, %v3056_v48, %v851_v50  ;;  %v1377_v42 = vpop.permute.xlu1 %1376  ;;  %v994_v39 = vpop.permute.xlu0 %993  ;;  %v2550_v44 = vld [vmem:[#allocation2 + $0xb0] ss:$72 sps:$4 sm:$0xff]  }
 0x122   :  { %941 = vst [vmem:[#allocation2 + $0x74] sm:$0x33] %v929_v46  ;;  %864 = vst [vmem:[#allocation2 + $0x2c] sm:$0xcc] %v852_v41  ;;  %v1001_v53 = vrot.slane %v994_v39, 4  ;;  %v1386_v54 = vrot.slane %v1377_v42, 4 }
 0x124   :  { %v1006_v57 = vsel %vm166_vm0, %v1000_v10, %v1001_v53 }
 0x125   :  { %v1007_v58 = vsel %vm325_vm4, %v3077_v6, %v1006_v57  ;;  %v3139_v49 = vpop.permute.xlu1 %840  ;;  %v3141_v59 = vpop.permute.xlu0 %1378  ;;  %v2552_v61 = vld [vmem:[#allocation2 + $0xb4] ss:$72 sps:$4 sm:$0xff]  }
 0x126   :  { %1019 = vst [vmem:[#allocation2 + $0x74] sm:$0xcc] %v1007_v58  ;;  %v847_v48 = vrot.slane %v3139_v49, 4  ;;  %v1387_v1 = vrot.slane %v3141_v59, 4  ;;  %1920 = vmatprep.subr.bf16.mxu0 %v2552_v61  ;;  %v2561_v58 = vld [vmem:[#allocation2 + $0xb8] ss:$72 sps:$4 sm:$0xff]  }
 0x127   :  { %1921 = vmatpush1.bf16.msra.mxu0 %v2550_v44 }
 0x128   :  { %v853_v4 = vsel %vm166_vm0, %v846_v33, %v847_v48  ;;  %v1391_v6 = vsel %vm166_vm0, %v1386_v54, %v1387_v1 }
 0x129   :  { %v854_v8 = vsel %vm168_vm2, %v839_v40, %v853_v4  ;;  %v1392_v9 = vsel %vm717_vm8, %v1377_v42, %v1391_v6  ;;  %v3153_v43 = vpop.permute.xlu1 %995  ;;  %v3155_v10 = vpop.permute.xlu0 %917 }
 0x12a   :  { %865 = vst [vmem:[#allocation2 + $0x34] sm:$0xcc] %v854_v8  ;;  %1405 = vst [vmem:[#allocation2 + $0x144] sm:$0x33] %v1392_v9  ;;  %v1002_v55 = vrot.slane %v3153_v43, 4  ;;  %v924_v51 = vrot.slane %v3155_v10, 4 }
 0x12c   :  { %v1008_v11 = vsel %vm166_vm0, %v1001_v53, %v1002_v55  ;;  %v930_v52 = vsel %vm166_vm0, %v923_v45, %v924_v51 }
 0x12d   :  { %v1009_v12 = vsel %vm325_vm4, %v994_v39, %v1008_v11  ;;  %v931_v5 = vsel %vm246_vm1, %v916_v38, %v930_v52  ;;  %v1149_v18 = vpop.permute.xlu1 %1148  ;;  %v1071_v0 = vpop.permute.xlu0 %1070  ;;  %v2555_v16 = vld [vmem:[#allocation2 + $0x2c] ss:$72 sps:$4 sm:$0xff]   ;;  %v2558_v38 = vld [vmem:[#allocation2 + $0x30] ss:$72 sps:$4 sm:$0xff]  }
 0x12e   :  { %1020 = vst [vmem:[#allocation2 + $0x7c] sm:$0xcc] %v1009_v12  ;;  %942 = vst [vmem:[#allocation2 + $0x7c] sm:$0x33] %v931_v5  ;;  %v1156_v21 = vrot.slane %v1149_v18, 4  ;;  %v1078_v23 = vrot.slane %v1071_v0, 4  ;;  %1961 = vmatprep.subr.bf16.mxu1 %v2555_v16 }
 0x12f   :  { %1962 = vmatpush1.bf16.msra.mxu1 %v2553_v20 }
 0x130   :  { %v1161_v24 = vsel %vm166_vm0, %v1155_v63, %v1156_v21  ;;  %v1083_v27 = vsel %vm166_vm0, %v1077_v17, %v1078_v23 }
 0x131   :  { %v1162_v28 = vsel %vm482_vm5, %v3098_v62, %v1161_v24  ;;  %v1084_v7 = vsel %vm403_vm3, %v3091_v14, %v1083_v27  ;;  %v1304_v60 = vpop.permute.xlu1 %1303  ;;  %v1226_v2 = vpop.permute.xlu0 %1225  ;;  %v1452_v56 = vld [vmem:[#allocation2 + $0x140] sm:$0x33] }
 0x132   :  { %1174 = vst [vmem:[#allocation2 + $0xbc] sm:$0xcc] %v1162_v28  ;;  %1096 = vst [vmem:[#allocation2 + $0xbc] sm:$0x33] %v1084_v7  ;;  %v1311_v31 = vrot.slane %v1304_v60, 4  ;;  %v1233_v32 = vrot.slane %v1226_v2, 4  ;;  %v2453_v34 = vcombine.high %v1452_v56, %v1452_v56  ;;  %v2452_v63 = vcombine.low %v1452_v56, %v1452_v56 }
 0x134   :  { %v1316_v17 = vsel %vm166_vm0, %v1310_v22, %v1311_v31  ;;  %v1238_v62 = vsel %vm166_vm0, %v1232_v29, %v1233_v32  ;;  %2470 = vmatprep.subr.msk.bf16.mxu0 %vm1691_vm9, %v2453_v34  ;;  %v1717_v14 = vsel %vm1691_vm9, %v2452_v63, 0 }
 0x135   :  { %v1317_v26 = vsel %vm639_vm7, %v3114_v35, %v1316_v17  ;;  %v1239_v36 = vsel %vm560_vm6, %v3105_v25, %v1238_v62  ;;  %v3189_v13 = vpop.permute.xlu1 %1150  ;;  %v3191_v15 = vpop.permute.xlu0 %1072  ;;  %1923 = vmatpush1.bf16.msra.mxu0 %v1717_v14  ;;  %v2560_v22 = vld [vmem:[#allocation2 + $0x34] ss:$72 sps:$4 sm:$0xff]  }
 0x136   :  { %1329 = vst [vmem:[#allocation2 + $0x104] sm:$0xcc] %v1317_v26  ;;  %1251 = vst [vmem:[#allocation2 + $0x104] sm:$0x33] %v1239_v36  ;;  %v1157_v29 = vrot.slane %v3189_v13, 4  ;;  %v1079_v37 = vrot.slane %v3191_v15, 4  ;;  %2004 = vmatprep.subr.bf16.mxu0 %v2560_v22 }
 0x138   :  { %v1163_v35 = vsel %vm166_vm0, %v1156_v21, %v1157_v29  ;;  %v1085_v25 = vsel %vm166_vm0, %v1078_v23, %v1079_v37  ;;  %2471 = vmatmul.mubr.msk.bf16.vlgmr.msra.gmra.mrb[8].mxu0 %vm1687_vm10, %v2971_v30 }
 0x139   :  { %v1164_v40 = vsel %vm482_vm5, %v1149_v18, %v1163_v35  ;;  %v1086_v45 = vsel %vm403_vm3, %v1071_v0, %v1085_v25  ;;  %v3203_v33 = vpop.permute.xlu1 %1305  ;;  %v3205_v47 = vpop.permute.xlu0 %1227  ;;  %2005 = vmatpush1.bf16.msra.mxu0 %v2558_v38  ;;  %2036 = vmatprep.mubr.bf16.mxu0 %v2673_v19 }
 0x13a   :  { %1175 = vst [vmem:[#allocation2 + $0xc4] sm:$0xcc] %v1164_v40  ;;  %1097 = vst [vmem:[#allocation2 + $0xc4] sm:$0x33] %v1086_v45  ;;  %v1312_v50 = vrot.slane %v3203_v33, 4  ;;  %v1234_v46 = vrot.slane %v3205_v47, 4 }
 0x13c   :  { %v1318_v41 = vsel %vm166_vm0, %v1311_v31, %v1312_v50  ;;  %v1240_v42 = vsel %vm166_vm0, %v1233_v32, %v1234_v46 }
 0x13d   :  { %v1319_v39 = vsel %vm639_vm7, %v1304_v60, %v1318_v41  ;;  %v1241_v53 = vsel %vm560_vm6, %v1226_v2, %v1240_v42  ;;  %v843_v54 = vpop.permute.xlu1 %842  ;;  %v1381_v57 = vpop.permute.xlu0 %1380  ;;  %v2563_v44 = vld [vmem:[#allocation2 + $0xbc] ss:$72 sps:$4 sm:$0xff]   ;;  %v2564_v24 = vld [vmem:[#allocation2 + $0xc0] ss:$72 sps:$4 sm:$0xff]  }
 0x13e   :  { %1330 = vst [vmem:[#allocation2 + $0x10c] sm:$0xcc] %v1319_v39  ;;  %1252 = vst [vmem:[#allocation2 + $0x10c] sm:$0x33] %v1241_v53  ;;  %v848_v61 = vrot.slane %v843_v54, 4  ;;  %v1388_v4 = vrot.slane %v1381_v57, 4  ;;  %1963 = vmatprep.subr.bf16.mxu1 %v2563_v44 }
 0x13f   :  { %1964 = vmatpush1.bf16.msra.mxu1 %v2561_v58  ;;  %v2569_v41 = vld [vmem:[#allocation2 + $0x38] ss:$72 sps:$4 sm:$0xff]  }
 0x140   :  { %v855_v6 = vsel %vm166_vm0, %v847_v48, %v848_v61  ;;  %v857_v8 = vsel %vm168_vm2, %v843_v54, %v848_v61  ;;  %v1393_v9 = vsel %vm166_vm0, %v1387_v1, %v1388_v4 }
 0x141   :  { %v856_v11 = vsel %vm168_vm2, %v3139_v49, %v855_v6  ;;  %867 = vst [vmem:[#allocation2 + $0x44] sm:$0xc] %v857_v8  ;;  %v1394_v52 = vsel %vm717_vm8, %v3141_v59, %v1393_v9  ;;  %v998_v12 = vpop.permute.xlu1 %997  ;;  %v920_v5 = vpop.permute.xlu0 %919 }
 0x142   :  { %866 = vst [vmem:[#allocation2 + $0x3c] sm:$0xcc] %v856_v11  ;;  %1406 = vst [vmem:[#allocation2 + $0x14c] sm:$0x33] %v1394_v52  ;;  %v1003_v18 = vrot.slane %v998_v12, 4  ;;  %v925_v48 = vrot.slane %v920_v5, 4 }
 0x144   :  { %v1010_v0 = vsel %vm166_vm0, %v1002_v55, %v1003_v18  ;;  %v1012_v1 = vsel %vm325_vm4, %v998_v12, %v1003_v18  ;;  %v932_v49 = vsel %vm166_vm0, %v924_v51, %v925_v48  ;;  %v934_v20 = vsel %vm246_vm1, %v920_v5, %v925_v48 }
 0x145   :  { %v1011_v59 = vsel %vm325_vm4, %v3153_v43, %v1010_v0  ;;  %1022 = vst [vmem:[#allocation2 + $0x8c] sm:$0xc] %v1012_v1  ;;  %v933_v16 = vsel %vm246_vm1, %v3155_v10, %v932_v49  ;;  %944 = vst [vmem:[#allocation2 + $0x8c] sm:$0x3] %v934_v20  ;;  %v1075_v21 = vpop.permute.xlu1 %1074  ;;  %v1383_v23 = vpop.permute.xlu0 %1382  ;;  %v2566_v55 = vld [vmem:[#allocation2 + $0xc4] ss:$72 sps:$4 sm:$0xff]  }
 0x146   :  { %1021 = vst [vmem:[#allocation2 + $0x84] sm:$0xcc] %v1011_v59  ;;  %943 = vst [vmem:[#allocation2 + $0x84] sm:$0x33] %v933_v16  ;;  %v1080_v27 = vrot.slane %v1075_v21, 4  ;;  %v1389_v28 = vrot.slane %v1383_v23, 4  ;;  %2006 = vmatprep.subr.bf16.mxu0 %v2566_v55 }
 0x147   :  { %2007 = vmatpush1.bf16.msra.mxu0 %v2564_v24  ;;  %v2577_v44 = vld [vmem:[#allocation2 + $0xc8] ss:$72 sps:$4 sm:$0xff]   ;;  %v3283_v48 = vsub.s32 0, %v2730_v3  ;;  %v3285_v0 = vld [vmem:[#allocation7] sm:$0xff]  ;;  %v3288_v1 = vsub.s32 1, %v2730_v3 }
 0x148   :  { %v1087_v51 = vsel %vm166_vm0, %v1079_v37, %v1080_v27  ;;  %v1089_v7 = vsel %vm403_vm3, %v1075_v21, %v1080_v27  ;;  %v1395_v43 = vsel %vm166_vm0, %v1388_v4, %v1389_v28 }
 0x149   :  { %v1088_v10 = vsel %vm403_vm3, %v3191_v15, %v1087_v51  ;;  %1099 = vst [vmem:[#allocation2 + $0xd4] sm:$0x3] %v1089_v7  ;;  %v1396_v60 = vsel %vm717_vm8, %v1381_v57, %v1395_v43  ;;  %v1230_v2 = vpop.permute.xlu1 %1229  ;;  %v1153_v56 = vpop.permute.xlu0 %1152  ;;  %v1453_v31 = vld [vmem:[#allocation2 + $0x148] sm:$0x33]  ;;  %v2142_v49 = vrot.slane %v3285_v0, %v3283_v48  ;;  %v2146_v20 = vrot.slane %v3285_v0, %v3288_v1 }
 0x14a   :  { %1098 = vst [vmem:[#allocation2 + $0xcc] sm:$0x33] %v1088_v10  ;;  %1407 = vst [vmem:[#allocation2 + $0x154] sm:$0x33] %v1396_v60  ;;  %v1235_v32 = vrot.slane %v1230_v2, 4  ;;  %v1158_v34 = vrot.slane %v1153_v56, 4  ;;  %v2455_v63 = vcombine.high %v1453_v31, %v1453_v31  ;;  %v2454_v17 = vcombine.low %v1453_v31, %v1453_v31 }
 0x14b   :  { %v2149_v31 = vsub.s32 2, %v2730_v3 }
 0x14c   :  { %v1242_v62 = vsel %vm166_vm0, %v1234_v46, %v1235_v32  ;;  %v1244_v14 = vsel %vm560_vm6, %v1230_v2, %v1235_v32  ;;  %v1165_v26 = vsel %vm166_vm0, %v1157_v29, %v1158_v34  ;;  %v1167_v36 = vsel %vm482_vm5, %v1153_v56, %v1158_v34  ;;  %2472 = vmatprep.subr.msk.bf16.mxu1 %vm1691_vm9, %v2455_v63  ;;  %v2576_v58 = vld [vmem:[#allocation2 + $0x44] ss:$72 sps:$4 sm:$0xff]  }
 0x14d   :  { %v1243_v15 = vsel %vm560_vm6, %v3205_v47, %v1242_v62  ;;  %1254 = vst [vmem:[#allocation2 + $0x11c] sm:$0x3] %v1244_v14  ;;  %v1166_v22 = vsel %vm482_vm5, %v3189_v13, %v1165_v26  ;;  %1177 = vst [vmem:[#allocation2 + $0xd4] sm:$0xc] %v1167_v36  ;;  %v1385_v37 = vpop.permute.xlu1 %1384  ;;  %v1308_v38 = vpop.permute.xlu0 %1307  ;;  %v1723_v35 = vsel %vm1691_vm9, %v2454_v17, 0  ;;  %v2153_v32 = vsub.s32 3, %v2730_v3 }
 0x14e   :  { %v2571_v25 = vld [vmem:[#allocation2 + $0x3c] ss:$72 sps:$4 sm:$0xff]   ;;  %1253 = vst [vmem:[#allocation2 + $0x114] sm:$0x33] %v1243_v15  ;;  %1176 = vst [vmem:[#allocation2 + $0xcc] sm:$0xcc] %v1166_v22  ;;  %1966 = vmatpush1.bf16.msra.mxu1 %v1723_v35  ;;  %v2150_v34 = vrot.slane %v3285_v0, %v2149_v31 }
 0x14f   :  { %v1390_v29 = vrot.slane %v1385_v37, 4  ;;  %v1313_v40 = vrot.slane %v1308_v38, 4  ;;  %2047 = vmatprep.subr.bf16.mxu1 %v2571_v25  ;;  %v2154_v63 = vrot.slane %v3285_v0, %v2153_v32  ;;  %v2157_v62 = vsub.s32 4, %v2730_v3 }
 0x150   :  { %v2161_v14 = vsub.s32 5, %v2730_v3 }
 0x151   :  { %v1397_v45 = vsel %vm166_vm0, %v1389_v28, %v1390_v29  ;;  %v1399_v47 = vsel %vm717_vm8, %v1385_v37, %v1390_v29  ;;  %v1320_v13 = vsel %vm166_vm0, %v1312_v50, %v1313_v40  ;;  %v1322_v46 = vsel %vm639_vm7, %v1308_v38, %v1313_v40  ;;  %2473 = vmatmul.mubr.msk.bf16.vlgmr.msra.gmra.mrb[8].mxu1 %vm1687_vm10, %v2971_v30  ;;  %v1454_v53 = vld [vmem:[#allocation2 + $0x150] sm:$0x33] }
 0x152   :  { %v1398_v42 = vsel %vm717_vm8, %v1383_v23, %v1397_v45  ;;  %1409 = vst [vmem:[#allocation2 + $0x164] sm:$0x3] %v1399_v47  ;;  %v1321_v39 = vsel %vm639_vm7, %v3203_v33, %v1320_v13  ;;  %1332 = vst [vmem:[#allocation2 + $0x11c] sm:$0xc] %v1322_v46  ;;  %2048 = vmatpush1.bf16.msra.mxu1 %v2569_v41  ;;  %v2457_v54 = vcombine.high %v1454_v53, %v1454_v53  ;;  %v2574_v33 = vld [vmem:[#allocation2 + $0x40] ss:$72 sps:$4 sm:$0xff]  }
 0x153   :  { %1408 = vst [vmem:[#allocation2 + $0x15c] sm:$0x33] %v1398_v42  ;;  %1331 = vst [vmem:[#allocation2 + $0x114] sm:$0xcc] %v1321_v39  ;;  %v2456_v57 = vcombine.low %v1454_v53, %v1454_v53  ;;  %2079 = vmatprep.mubr.bf16.mxu1 %v2673_v19  ;;  %v2158_v45 = vrot.slane %v3285_v0, %v2157_v62  ;;  %v2162_v47 = vrot.slane %v3285_v0, %v2161_v14 }
 0x154   :  { %2474 = vmatprep.subr.msk.bf16.mxu0 %vm1691_vm9, %v2457_v54 }
 0x155   :  { %v1729_v50 = vsel %vm1691_vm9, %v2456_v57, 0 }
 0x156   :  { %2009 = vmatpush1.bf16.msra.mxu0 %v1729_v50 }
 0x157   :  { %2090 = vmatprep.subr.bf16.mxu0 %v2576_v58 }
 0x159   :  { %2475 = vmatmul.mubr.msk.bf16.vlgmr.msra.gmra.mrb[12].mxu0 %vm1687_vm10, %v2971_v30  ;;  %v2582_v4 = vld [vmem:[#allocation2 + $0xd4] ss:$72 sps:$4 sm:$0xff]  }
 0x15a   :  { %2091 = vmatpush1.bf16.msra.mxu0 %v2574_v33  ;;  %v2579_v61 = vld [vmem:[#allocation2 + $0xcc] ss:$72 sps:$4 sm:$0xff]   ;;  %2122 = vmatprep.mubr.bf16.mxu0 %v2673_v19  ;;  %v2580_v6 = vld [vmem:[#allocation2 + $0xd0] ss:$72 sps:$4 sm:$0xff]   ;;  %v1456_v9 = vld [vmem:[#allocation2 + $0x160] sm:$0x33] }
 0x15b   :  { %2049 = vmatprep.subr.bf16.mxu1 %v2579_v61  ;;  %v1455_v8 = vld [vmem:[#allocation2 + $0x158] sm:$0x33]  ;;  %2092 = vmatprep.subr.bf16.mxu0 %v2582_v4  ;;  %v2461_v52 = vcombine.high %v1456_v9, %v1456_v9  ;;  %v2460_v5 = vcombine.low %v1456_v9, %v1456_v9 }
 0x15c   :  { %2050 = vmatpush1.bf16.msra.mxu1 %v2577_v44  ;;  %v2459_v11 = vcombine.high %v1455_v8, %v1455_v8  ;;  %v2458_v12 = vcombine.low %v1455_v8, %v1455_v8 }
 0x15d   :  { %v1741_v19 = vsel %vm1691_vm9, %v2460_v5, 0 }
 0x15e   :  { %2093 = vmatpush1.bf16.msra.mxu0 %v2580_v6  ;;  %2476 = vmatprep.subr.msk.bf16.mxu1 %vm1691_vm9, %v2459_v11  ;;  %v1735_v18 = vsel %vm1691_vm9, %v2458_v12, 0 }
 0x15f   :  { %2478 = vmatprep.subr.msk.bf16.mxu0 %vm1691_vm9, %v2461_v52 }
 0x160   :  { %2052 = vmatpush1.bf16.msra.mxu1 %v1735_v18 }
 0x162   :  { %2095 = vmatpush1.bf16.msra.mxu0 %v1741_v19 }
 0x163   :  { %2477 = vmatmul.mubr.msk.bf16.vlgmr.msra.gmra.mrb[12].mxu1 %vm1687_vm10, %v2971_v30 }
 0x165   :  { %2479 = vmatmul.mubr.msk.bf16.vlgmr.msra.gmra.mrb[16].mxu0 %vm1687_vm10, %v2971_v30 }
 0x1bb   :  { %v1780_v59 = vpop.f32.mrb[0].mxu0 }
 0x1bc   :  { %v2229_v16 = vmul.f32 %v2142_v49, %v1780_v59  ;;  %v1782_v21 = vpop.f32.mrb[1].mxu0 }
 0x1bd   :  { %v2230_v23 = vmul.f32 %v2146_v20, %v1782_v21  ;;  %v1784_v24 = vpop.f32.mrb[2].mxu0 }
 0x1be   :  { %v2306_v30 = vmul.f32 %v2229_v16, %v1780_v59  ;;  %v2247_v55 = vmul.f32 %v2142_v49, %v1784_v24  ;;  %v1786_v27 = vpop.f32.mrb[3].mxu0 }
 0x1bf   :  { %v2265_v28 = vadd.f32 %v2230_v23, %v2229_v16  ;;  %v2307_v51 = vmul.f32 %v2230_v23, %v1782_v21  ;;  %v2248_v7 = vmul.f32 %v2146_v20, %v1786_v27 }
 0x1c0   :  { %v2324_v43 = vmul.f32 %v2247_v55, %v1784_v24  ;;  %v2165_v24 = vsub.s32 6, %v2730_v3 }
 0x1c1   :  { %v2342_v10 = vadd.f32 %v2307_v51, %v2306_v30  ;;  %v2284_v60 = vadd.f32 %v2248_v7, %v2247_v55  ;;  %v2325_v2 = vmul.f32 %v2248_v7, %v1786_v27  ;;  %v2169_v30 = vsub.s32 7, %v2730_v3 }
 0x1c2   :  { %v2166_v55 = vrot.slane %v3285_v0, %v2165_v24 }
 0x1c3   :  { %v2361_v56 = vadd.f32 %v2325_v2, %v2324_v43  ;;  %v2170_v27 = vrot.slane %v3285_v0, %v2169_v30 }
 0x1d4   :  { %v1823_v17 = vpop.f32.mrb[0].mxu1 }
 0x1d5   :  { %v2231_v26 = vmul.f32 %v2150_v34, %v1823_v17  ;;  %v1825_v36 = vpop.f32.mrb[1].mxu1 }
 0x1d6   :  { %v2232_v15 = vmul.f32 %v2154_v63, %v1825_v36  ;;  %v1827_v22 = vpop.f32.mrb[2].mxu1 }
 0x1d7   :  { %v2266_v37 = vadd.f32 %v2265_v28, %v2231_v26  ;;  %v2308_v38 = vmul.f32 %v2231_v26, %v1823_v17  ;;  %v2249_v35 = vmul.f32 %v2150_v34, %v1827_v22  ;;  %v1829_v25 = vpop.f32.mrb[3].mxu1 }
 0x1d8   :  { %v2309_v29 = vmul.f32 %v2232_v15, %v1825_v36  ;;  %v2250_v40 = vmul.f32 %v2154_v63, %v1829_v25 }
 0x1d9   :  { %v2343_v13 = vadd.f32 %v2342_v10, %v2308_v38  ;;  %v2267_v46 = vadd.f32 %v2266_v37, %v2232_v15  ;;  %v2285_v41 = vadd.f32 %v2284_v60, %v2249_v35  ;;  %v2326_v42 = vmul.f32 %v2249_v35, %v1827_v22 }
 0x1da   :  { %v2327_v39 = vmul.f32 %v2250_v40, %v1829_v25 }
 0x1db   :  { %v2344_v53 = vadd.f32 %v2343_v13, %v2309_v29  ;;  %v2362_v54 = vadd.f32 %v2361_v56, %v2326_v42  ;;  %v2286_v57 = vadd.f32 %v2285_v41, %v2250_v40  ;;  %v3318_v29 = vld [vmem:[#allocation7 + $0x8] sm:$0xff] }
 0x1dc   :  { %v1866_v50 = vpop.f32.mrb[4].mxu0  ;;  %v2174_v40 = vrot.slane %v3318_v29, %v3283_v48 }
 0x1dd   :  { %v2233_v58 = vmul.f32 %v2158_v45, %v1866_v50  ;;  %v1868_v33 = vpop.f32.mrb[5].mxu0  ;;  %v2363_v44 = vadd.f32 %v2362_v54, %v2327_v39 }
 0x1de   :  { %v2234_v61 = vmul.f32 %v2162_v47, %v1868_v33  ;;  %v1870_v4 = vpop.f32.mrb[6].mxu0 }
 0x1df   :  { %v2268_v6 = vadd.f32 %v2267_v46, %v2233_v58  ;;  %v2310_v8 = vmul.f32 %v2233_v58, %v1866_v50  ;;  %v2251_v9 = vmul.f32 %v2158_v45, %v1870_v4  ;;  %v1872_v11 = vpop.f32.mrb[7].mxu0  ;;  %v2178_v45 = vrot.slane %v3318_v29, %v3288_v1 }
 0x1e0   :  { %v2311_v52 = vmul.f32 %v2234_v61, %v1868_v33  ;;  %v2252_v12 = vmul.f32 %v2162_v47, %v1872_v11 }
 0x1e1   :  { %v2345_v5 = vadd.f32 %v2344_v53, %v2310_v8  ;;  %v2269_v18 = vadd.f32 %v2268_v6, %v2234_v61  ;;  %v2287_v19 = vadd.f32 %v2286_v57, %v2251_v9  ;;  %v2328_v49 = vmul.f32 %v2251_v9, %v1870_v4 }
 0x1e2   :  { %v2329_v20 = vmul.f32 %v2252_v12, %v1872_v11 }
 0x1e3   :  { %v2346_v59 = vadd.f32 %v2345_v5, %v2311_v52  ;;  %v2364_v16 = vadd.f32 %v2363_v44, %v2328_v49  ;;  %v2288_v21 = vadd.f32 %v2287_v19, %v2252_v12  ;;  %v2182_v12 = vrot.slane %v3318_v29, %v2149_v31 }
 0x1e4   :  { %v2186_v5 = vrot.slane %v3318_v29, %v2153_v32  ;;  %v2194_v31 = vrot.slane %v3318_v29, %v2161_v14 }
 0x1e5   :  { %v2365_v23 = vadd.f32 %v2364_v16, %v2329_v20 }
 0x1f0   :  { %v1909_v28 = vpop.f32.mrb[4].mxu1 }
 0x1f1   :  { %v2235_v51 = vmul.f32 %v2166_v55, %v1909_v28  ;;  %v1911_v7 = vpop.f32.mrb[5].mxu1 }
 0x1f2   :  { %v2236_v43 = vmul.f32 %v2170_v27, %v1911_v7  ;;  %v1913_v10 = vpop.f32.mrb[6].mxu1 }
 0x1f3   :  { %v2270_v60 = vadd.f32 %v2269_v18, %v2235_v51  ;;  %v2312_v2 = vmul.f32 %v2235_v51, %v1909_v28  ;;  %v2253_v56 = vmul.f32 %v2166_v55, %v1913_v10  ;;  %v1915_v34 = vpop.f32.mrb[7].mxu1  ;;  %v2190_v51 = vrot.slane %v3318_v29, %v2157_v62 }
 0x1f4   :  { %v2313_v63 = vmul.f32 %v2236_v43, %v1911_v7  ;;  %v2254_v17 = vmul.f32 %v2170_v27, %v1915_v34 }
 0x1f5   :  { %v2347_v26 = vadd.f32 %v2346_v59, %v2312_v2  ;;  %v2271_v36 = vadd.f32 %v2270_v60, %v2236_v43  ;;  %v2289_v15 = vadd.f32 %v2288_v21, %v2253_v56  ;;  %v2330_v22 = vmul.f32 %v2253_v56, %v1913_v10 }
 0x1f6   :  { %v2331_v37 = vmul.f32 %v2254_v17, %v1915_v34 }
 0x1f7   :  { %v2348_v38 = vadd.f32 %v2347_v26, %v2313_v63  ;;  %v2366_v35 = vadd.f32 %v2365_v23, %v2330_v22  ;;  %v2290_v25 = vadd.f32 %v2289_v15, %v2254_v17 }
 0x1f9   :  { %v2367_v0 = vadd.f32 %v2366_v35, %v2331_v37 }
 0x20b   :  { %v1952_v47 = vpop.f32.mrb[8].mxu0 }
 0x20c   :  { %v2237_v13 = vmul.f32 %v2174_v40, %v1952_v47  ;;  %v1954_v46 = vpop.f32.mrb[9].mxu0 }
 0x20d   :  { %v2238_v41 = vmul.f32 %v2178_v45, %v1954_v46  ;;  %v1956_v42 = vpop.f32.mrb[10].mxu0 }
 0x20e   :  { %v2272_v39 = vadd.f32 %v2271_v36, %v2237_v13  ;;  %v2314_v53 = vmul.f32 %v2237_v13, %v1952_v47  ;;  %v2255_v54 = vmul.f32 %v2174_v40, %v1956_v42  ;;  %v1958_v57 = vpop.f32.mrb[11].mxu0 }
 0x20f   :  { %v2315_v50 = vmul.f32 %v2238_v41, %v1954_v46  ;;  %v2256_v58 = vmul.f32 %v2178_v45, %v1958_v57 }
 0x210   :  { %v2349_v33 = vadd.f32 %v2348_v38, %v2314_v53  ;;  %v2273_v44 = vadd.f32 %v2272_v39, %v2238_v41  ;;  %v2291_v61 = vadd.f32 %v2290_v25, %v2255_v54  ;;  %v2332_v4 = vmul.f32 %v2255_v54, %v1956_v42  ;;  %v2135_v39 = vld [vmem:[#allocation7 + $0x10] sm:$0x3] }
 0x211   :  { %v2333_v6 = vmul.f32 %v2256_v58, %v1958_v57  ;;  %v2198_v53 = vrot.slane %v3318_v29, %v2165_v24  ;;  %v2202_v57 = vrot.slane %v3318_v29, %v2169_v30 }
 0x212   :  { %v2350_v8 = vadd.f32 %v2349_v33, %v2315_v50  ;;  %v2368_v9 = vadd.f32 %v2367_v0, %v2332_v4  ;;  %v2292_v11 = vadd.f32 %v2291_v61, %v2256_v58  ;;  %v2206_v50 = vrot.slane %v2135_v39, %v3283_v48 }
 0x213   :  { %v2210_v4 = vrot.slane %v2135_v39, %v3288_v1 }
 0x214   :  { %v2369_v52 = vadd.f32 %v2368_v9, %v2333_v6 }
 0x224   :  { %v1995_v18 = vpop.f32.mrb[8].mxu1 }
 0x225   :  { %v2239_v19 = vmul.f32 %v2182_v12, %v1995_v18  ;;  %v1997_v49 = vpop.f32.mrb[9].mxu1 }
 0x226   :  { %v2240_v20 = vmul.f32 %v2186_v5, %v1997_v49  ;;  %v1999_v59 = vpop.f32.mrb[10].mxu1 }
 0x227   :  { %v2274_v16 = vadd.f32 %v2273_v44, %v2239_v19  ;;  %v2316_v21 = vmul.f32 %v2239_v19, %v1995_v18  ;;  %v2257_v23 = vmul.f32 %v2182_v12, %v1999_v59  ;;  %v2001_v55 = vpop.f32.mrb[11].mxu1 }
 0x228   :  { %v2317_v27 = vmul.f32 %v2240_v20, %v1997_v49  ;;  %v2258_v28 = vmul.f32 %v2186_v5, %v2001_v55 }
 0x229   :  { %v2351_v32 = vadd.f32 %v2350_v8, %v2316_v21  ;;  %v2275_v7 = vadd.f32 %v2274_v16, %v2240_v20  ;;  %v2293_v43 = vadd.f32 %v2292_v11, %v2257_v23  ;;  %v2334_v10 = vmul.f32 %v2257_v23, %v1999_v59 }
 0x22a   :  { %v2335_v60 = vmul.f32 %v2258_v28, %v2001_v55 }
 0x22b   :  { %v2352_v2 = vadd.f32 %v2351_v32, %v2317_v27  ;;  %v2370_v56 = vadd.f32 %v2369_v52, %v2334_v10  ;;  %v2294_v34 = vadd.f32 %v2293_v43, %v2258_v28 }
 0x22c   :  { %v2038_v63 = vpop.f32.mrb[12].mxu0 }
 0x22d   :  { %v2241_v17 = vmul.f32 %v2190_v51, %v2038_v63  ;;  %v2040_v26 = vpop.f32.mrb[13].mxu0  ;;  %v2371_v36 = vadd.f32 %v2370_v56, %v2335_v60 }
 0x22e   :  { %v2242_v15 = vmul.f32 %v2194_v31, %v2040_v26  ;;  %v2042_v22 = vpop.f32.mrb[14].mxu0 }
 0x22f   :  { %v2276_v37 = vadd.f32 %v2275_v7, %v2241_v17  ;;  %v2318_v62 = vmul.f32 %v2241_v17, %v2038_v63  ;;  %v2259_v38 = vmul.f32 %v2190_v51, %v2042_v22  ;;  %v2044_v35 = vpop.f32.mrb[15].mxu0 }
 0x230   :  { %v2319_v25 = vmul.f32 %v2242_v15, %v2040_v26  ;;  %v2260_v14 = vmul.f32 %v2194_v31, %v2044_v35 }
 0x231   :  { %v2353_v0 = vadd.f32 %v2352_v2, %v2318_v62  ;;  %v2277_v40 = vadd.f32 %v2276_v37, %v2242_v15  ;;  %v2295_v45 = vadd.f32 %v2294_v34, %v2259_v38  ;;  %v2336_v47 = vmul.f32 %v2259_v38, %v2042_v22 }
 0x232   :  { %v2337_v13 = vmul.f32 %v2260_v14, %v2044_v35 }
 0x233   :  { %v2354_v46 = vadd.f32 %v2353_v0, %v2319_v25  ;;  %v2372_v41 = vadd.f32 %v2371_v36, %v2336_v47  ;;  %v2296_v42 = vadd.f32 %v2295_v45, %v2260_v14 }
 0x235   :  { %v2373_v54 = vadd.f32 %v2372_v41, %v2337_v13 }
 0x236   :  { %v2081_v58 = vpop.f32.mrb[12].mxu1 }
 0x237   :  { %v2243_v33 = vmul.f32 %v2198_v53, %v2081_v58  ;;  %v2083_v61 = vpop.f32.mrb[13].mxu1 }
 0x238   :  { %v2124_v44 = vpop.f32.mrb[16].mxu0  ;;  %v2244_v6 = vmul.f32 %v2202_v57, %v2083_v61  ;;  %v2085_v9 = vpop.f32.mrb[14].mxu1 }
 0x239   :  { %v2126_v8 = vpop.f32.mrb[17].mxu0  ;;  %v2278_v11 = vadd.f32 %v2277_v40, %v2243_v33  ;;  %v2320_v52 = vmul.f32 %v2243_v33, %v2081_v58  ;;  %v2245_v12 = vmul.f32 %v2206_v50, %v2124_v44  ;;  %v2261_v24 = vmul.f32 %v2198_v53, %v2085_v9  ;;  %v2087_v18 = vpop.f32.mrb[15].mxu1 }
 0x23a   :  { %v2128_v5 = vpop.f32.mrb[18].mxu0  ;;  %v2321_v3 = vmul.f32 %v2244_v6, %v2083_v61  ;;  %v2262_v19 = vmul.f32 %v2202_v57, %v2087_v18  ;;  %v2246_v49 = vmul.f32 %v2210_v4, %v2126_v8 }
 0x23b   :  { %v2130_v30 = vpop.f32.mrb[19].mxu0  ;;  %v2355_v29 = vadd.f32 %v2354_v46, %v2320_v52  ;;  %v2279_v48 = vadd.f32 %v2278_v11, %v2244_v6  ;;  %v2297_v20 = vadd.f32 %v2296_v42, %v2261_v24  ;;  %v2338_v59 = vmul.f32 %v2261_v24, %v2085_v9 }
 0x23c   :  { %v2263_v16 = vmul.f32 %v2206_v50, %v2128_v5  ;;  %v2339_v21 = vmul.f32 %v2262_v19, %v2087_v18  ;;  %v2322_v1 = vmul.f32 %v2245_v12, %v2124_v44  ;;  %v2264_v51 = vmul.f32 %v2210_v4, %v2130_v30 }
 0x23d   :  { %v2356_v23 = vadd.f32 %v2355_v29, %v2321_v3  ;;  %v2298_v55 = vadd.f32 %v2297_v20, %v2262_v19  ;;  %v2280_v27 = vadd.f32 %v2279_v48, %v2245_v12  ;;  %v2374_v28 = vadd.f32 %v2373_v54, %v2338_v59 }
 0x23e   :  { %v2323_v31 = vmul.f32 %v2246_v49, %v2126_v8  ;;  %v2340_v10 = vmul.f32 %v2263_v16, %v2128_v5  ;;  %v2341_v34 = vmul.f32 %v2264_v51, %v2130_v30 }
 0x23f   :  { %v2281_v32 = vadd.f32 %v2280_v27, %v2246_v49  ;;  %v2299_v7 = vadd.f32 %v2298_v55, %v2263_v16  ;;  %v2357_v43 = vadd.f32 %v2356_v23, %v2322_v1  ;;  %v2375_v60 = vadd.f32 %v2374_v28, %v2339_v21 }
 0x241   :  { %2282 = vadd.xlane.f32.xlu0 %v2281_v32  ;;  %v2300_v2 = vadd.f32 %v2299_v7, %v2264_v51  ;;  %v2358_v56 = vadd.f32 %v2357_v43, %v2323_v31  ;;  %v2376_v63 = vadd.f32 %v2375_v60, %v2340_v10 }
 0x243   :  { %2301 = vadd.xlane.f32.xlu1 %v2300_v2  ;;  %v2377_v17 = vadd.f32 %v2376_v63, %v2341_v34 }
 0x245   :  { %2359 = vadd.xlane.f32.xlu0 %v2358_v56 }
 0x249   :  { %2378 = vadd.xlane.f32.xlu0 %v2377_v17 }
 0x2ce   :  { %v2283_v26 = vpop.xlane.xlu0 %2282 }
 0x2cf   :  { %2304 = vst.msk [vmem:[%s3359_s3] sm:$0xff] %vm2303_vm11, %v2283_v26 }
 0x2d0   :  { %v2302_v36 = vpop.xlane.xlu1 %2301 }
 0x2d1   :  { %2305 = vst.msk [vmem:[%s3359_s3 + $0x8] sm:$0xff] %vm2303_vm11, %v2302_v36 }
 0x2d2   :  { %v2360_v15 = vpop.xlane.xlu0 %2359 }
 0x2d3   :  { %2480 = vst.msk [vmem:[%s3359_s3 + $0x10] sm:$0xff] %vm2303_vm11, %v2360_v15 }
 0x2d6   :  { %v2379_v22 = vpop.xlane.xlu0 %2378 }
 0x2d7   :  { %2481 = vst.msk [vmem:[%s3359_s3 + $0x18] sm:$0xff] %vm2303_vm11, %v2379_v22 }
 0x2d8   :  { %2387 = vsyncpa [#allocation4], 1 }
 0x2d9   :  { %2388 = vsyncpa [#allocation6], 1 }

</bundles_post_ra>
